<compile_context>
chip_gen: v7x
topology: tpu7x:2x2x1
jax: 0.10.0
libtpu: 0.0.40
codegen_flags: <defaults>
</compile_context>

<pallas_src>
import math
import itertools
import numpy as np

import jax
import jax.numpy as jnp
from jax.experimental import pallas as pl
from jax.experimental.pallas import tpu as pltpu

# ---------------- small, module-consistent config ----------------
DIM = 32                 # input channels ("dim")
KEY_DIM = 8
NUM_HEADS = 2
ATTN_RATIO = 2
RESOLUTION = 8           # H = W
D = ATTN_RATIO * KEY_DIM            # 16
DH = D * NUM_HEADS                  # 32
NH_KD = KEY_DIM * NUM_HEADS         # 16
RES2 = math.ceil(RESOLUTION / 2)    # 4
N = RESOLUTION * RESOLUTION         # 64
N2 = RES2 * RES2                    # 16
OUT_DIM = DIM
SCALE = KEY_DIM ** -0.5
BN_EPS = 1e-5
B = 2
TAPS = 9                 # 3x3 depthwise kernel taps


def _dot(a, b):
    # default precision: one MXU pass (bf16 operands), f32 accumulation
    return jnp.dot(a, b, preferred_element_type=jnp.float32)


# ---------------- the single fused Pallas kernel ----------------
def _make_fused_kernel(bsz):
    bn2 = bsz * N2

    def kernel(x_ref, m_ref, wql_ref, bql_ref, wvl_ref, bvl_ref,
               wq_ref, bq_ref, wkv_ref, bkv_ref, bias_ref, wp_ref, bp_ref, o_ref):
        x = x_ref[...]                                   # (bsz*N, DIM) token-major, all batches

        # ---- merged k|v 1x1 conv + folded BN: one matmul over all batches ----
        kv = _dot(x, wkv_ref[...]) + bkv_ref[...]        # (bsz*N, NH_KD + DH)
        kf = kv[:, :NH_KD]                               # (bsz*N, NH_KD)
        vf = kv[:, NH_KD:]                               # (bsz*N, DH)

        # ---- 3x3 stride-2 depthwise taps via one gather matmul per source ----
        # m_ref is a 0/1 matrix; row (t, b, p2) selects input token (b, g(p2, t)),
        # with zero rows where tap t falls in the zero padding.
        m = m_ref[...]                                   # (TAPS*bsz*N2, bsz*N)
        gx = _dot(m, x)                                  # taps of x  -> LGQuery.local
        gv = _dot(m, vf)                                 # taps of v  -> v_local

        wql = wql_ref[...]                               # (TAPS, DIM) tap-major dw weights
        wvl = wvl_ref[...]                               # (TAPS, DH)  (BN folded in)
        # AvgPool2d(kernel=1, stride=2, pad=0) == the (unweighted) centre tap.
        q_acc = gx[4 * bn2:5 * bn2]                      # pool_q        (bsz*N2, DIM)
        v_acc = jnp.zeros((bn2, DH), jnp.float32)
        for t in range(TAPS):                            # static unrolled: 9 per-channel MACs
            q_acc = q_acc + gx[t * bn2:(t + 1) * bn2] * wql[t:t + 1, :]
            v_acc = v_acc + gv[t * bn2:(t + 1) * bn2] * wvl[t:t + 1, :]
        qpre = q_acc + bql_ref[...]                      # local_q + pool_q   (LGQuery)
        vloc = v_acc + bvl_ref[...]                      # v_local (+ folded BN)

        # ---- LGQuery.proj: 1x1 conv + folded BN ----
        q = _dot(qpre, wq_ref[...]) + bq_ref[...]        # (bsz*N2, NH_KD)

        # ---- attention: static unrolled loop over (batch, head) ----
        per_batch = []
        for b in range(bsz):
            q_b = q[b * N2:(b + 1) * N2]                 # (N2, NH_KD)
            k_b = kf[b * N:(b + 1) * N]                  # (N,  NH_KD)
            v_b = vf[b * N:(b + 1) * N]                  # (N,  DH)
            heads = []
            for h in range(NUM_HEADS):
                qh = q_b[:, h * KEY_DIM:(h + 1) * KEY_DIM]   # (N2, KEY_DIM)
                kh = k_b[:, h * KEY_DIM:(h + 1) * KEY_DIM]   # (N,  KEY_DIM)
                vh = v_b[:, h * D:(h + 1) * D]               # (N,  D)
                logits = jax.lax.dot_general(
                    qh, kh, (((1,), (1,)), ((), ())),
                    preferred_element_type=jnp.float32) * SCALE + bias_ref[h]   # (N2, N)
                mx = jnp.max(logits, axis=-1, keepdims=True)
                p = jnp.exp(logits - mx)
                den = jnp.sum(p, axis=-1, keepdims=True)
                # defer softmax normalization to the (N2, D) output; divide on the EUP
                heads.append(_dot(p, vh) * pl.reciprocal(den, approx=True))
            per_batch.append(jnp.concatenate(heads, axis=-1))    # (N2, DH)
        attn_out = jnp.concatenate(per_batch, axis=0)             # (bsz*N2, DH)

        # ---- (attn + v_local) -> act -> proj 1x1 conv + folded BN; single store ----
        # TODO(synk): act_layer defaults to None in the PyTorch module; using tanh-approx GELU.
        y = jax.nn.gelu(attn_out + vloc, approximate=True)
        o_ref[...] = _dot(y, wp_ref[...]) + bp_ref[...]           # (bsz*N2, OUT_DIM)

    return kernel


def _full_spec(shape):
    nd = len(shape)
    return pl.BlockSpec(shape, lambda i, _nd=nd: (0,) * _nd)


def fused_pallas(x_tok, kp):
    bsz = x_tok.shape[0] // N
    args = (x_tok, kp['m'], kp['wql'], kp['bql'], kp['wvl'], kp['bvl'],
            kp['wq'], kp['bq'], kp['wkv'], kp['bkv'], kp['attn_bias'],
            kp['wp'], kp['bp'])
    return pl.pallas_call(
        _make_fused_kernel(bsz),
        out_shape=jax.ShapeDtypeStruct((bsz * N2, OUT_DIM), jnp.float32),
        grid=(1,),                                    # whole module in a single grid step
        in_specs=[_full_spec(a.shape) for a in args],
        out_specs=_full_spec((bsz * N2, OUT_DIM)),
        compiler_params=pltpu.CompilerParams(dimension_semantics=("arbitrary",)),
    )(*args)


def attention4d_downsample(x, kparams):
    bsz = x.shape[0]
    # NCHW -> token-major (tokens, channels), batch folded into the token axis
    x_tok = x.reshape(bsz, DIM, N).transpose(0, 2, 1).reshape(bsz * N, DIM)
    out_flat = fused_pallas(x_tok, kparams)           # (bsz*N2, OUT_DIM)
    return out_flat.reshape(bsz, N2, OUT_DIM).transpose(0, 2, 1).reshape(
        bsz, OUT_DIM, RES2, RES2)


# ---------------- one-off host-side weight re-layout ----------------
def build_gather_matrix(bsz):
    # 0/1 matrix turning the 3x3 stride-2 pad-1 depthwise conv (8x8 -> 4x4) into
    # "gather taps by matmul" + per-channel multiply-adds. Rows: tap-major, then
    # batch, then output position. Padding taps are all-zero rows.
    m = np.zeros((TAPS * bsz * N2, bsz * N), np.float32)
    for t in range(TAPS):
        kh, kw = t // 3, t % 3
        for b in range(bsz):
            for oi in range(RES2):
                for oj in range(RES2):
                    ii, jj = 2 * oi + kh - 1, 2 * oj + kw - 1
                    if 0 <= ii < RESOLUTION and 0 <= jj < RESOLUTION:
                        row = t * (bsz * N2) + b * N2 + oi * RES2 + oj
                        col = b * N + ii * RESOLUTION + jj
                        m[row, col] = 1.0
    return jnp.asarray(m)


def prep_kernel_params(params, bsz):
    return {
        'm': build_gather_matrix(bsz),
        'wql': params['q_local_w'][:, 0].reshape(DIM, TAPS).T,    # (TAPS, DIM) tap-major
        'bql': params['q_local_b'][None, :],
        'wvl': params['vloc_w'][:, 0].reshape(DH, TAPS).T,        # (TAPS, DH)
        'bvl': params['vloc_b'][None, :],
        'wq': params['wq'], 'bq': params['bq'],
        'wkv': jnp.concatenate([params['wk'], params['wv']], axis=1),   # merged k|v weight
        'bkv': jnp.concatenate([params['bk'], params['bv']], axis=1),
        'attn_bias': params['attn_bias'],
        'wp': params['wp'], 'bp': params['bp'],
    }


# ---------------- param init / BN folding / reference (plain JAX) ----------------
def depthwise_conv_s2_nchw(x, w, b):
    y = jax.lax.conv_general_dilated(
        x, w, window_strides=(2, 2), padding=((1, 1), (1, 1)),
        dimension_numbers=('NCHW', 'OIHW', 'NCHW'),
        feature_group_count=x.shape[1])
    return y + b[None, :, None, None]


def fold_conv1x1_bn(w, b, gamma, beta, mean, var):
    # eval-mode BN folded into the 1x1 conv -> matmul weight (Cin,Cout), bias (1,Cout)
    scale = gamma / jnp.sqrt(var + BN_EPS)
    wm = (w[:, :, 0, 0] * scale[:, None]).T
    bm = (b - mean) * scale + beta
    return wm, bm[None, :]


def fold_dw_bn(w, b, gamma, beta, mean, var):
    scale = gamma / jnp.sqrt(var + BN_EPS)
    return w * scale[:, None, None, None], (b - mean) * scale + beta


def build_attention_bias(key):
    points = list(itertools.product(range(RESOLUTION), range(RESOLUTION)))
    points_ = list(itertools.product(range(RES2), range(RES2)))
    step = math.ceil(RESOLUTION / RES2)
    attention_offsets, idxs = {}, []
    for p1 in points_:
        for p2 in points:
            size = 1
            offset = (abs(p1[0] * step - p2[0] + (size - 1) / 2),
                      abs(p1[1] * step - p2[1] + (size - 1) / 2))
            if offset not in attention_offsets:
                attention_offsets[offset] = len(attention_offsets)
            idxs.append(attention_offsets[offset])
    idxs = np.array(idxs, dtype=np.int32).reshape(N2, N)
    biases = jax.random.normal(key, (NUM_HEADS, len(attention_offsets)), jnp.float32) * 0.02
    return biases[:, idxs]          # (NUM_HEADS, N2, N)


def init_params(key):
    keys = jax.random.split(key, 40)
    kit = iter(keys)

    def nrm(shape, s=0.1):
        return jax.random.normal(next(kit), shape, jnp.float32) * s

    def bn(c):
        return (1.0 + nrm((c,)),                                   # gamma
                nrm((c,)),                                         # beta
                nrm((c,)),                                         # running mean
                0.5 + jax.random.uniform(next(kit), (c,), jnp.float32))  # running var

    p = {}
    # LGQuery.local : depthwise Conv2d(dim, dim, 3, s=2, p=1, groups=dim) (no BN)
    p['q_local_w'] = nrm((DIM, 1, 3, 3))
    p['q_local_b'] = nrm((DIM,))
    # LGQuery.proj : Conv2d(dim, nh_kd, 1) + BN  -> folded matmul
    p['wq'], p['bq'] = fold_conv1x1_bn(nrm((NH_KD, DIM, 1, 1)), nrm((NH_KD,)), *bn(NH_KD))
    # k : Conv2d(dim, nh_kd, 1) + BN
    p['wk'], p['bk'] = fold_conv1x1_bn(nrm((NH_KD, DIM, 1, 1)), nrm((NH_KD,)), *bn(NH_KD))
    # v : Conv2d(dim, nh*d, 1) + BN
    p['wv'], p['bv'] = fold_conv1x1_bn(nrm((DH, DIM, 1, 1)), nrm((DH,)), *bn(DH))
    # v_local : depthwise Conv2d(dh, dh, 3, s=2, p=1, groups=dh) + BN (folded)
    p['vloc_w'], p['vloc_b'] = fold_dw_bn(nrm((DH, 1, 3, 3)), nrm((DH,)), *bn(DH))
    # proj : act -> Conv2d(dh, out_dim, 1) + BN
    p['wp'], p['bp'] = fold_conv1x1_bn(nrm((OUT_DIM, DH, 1, 1)), nrm((OUT_DIM,)), *bn(OUT_DIM))
    # attention bias table, gathered to (H, N2, N)
    p['attn_bias'] = build_attention_bias(next(kit))
    return p


def reference(x, params):
    bsz = x.shape[0]
    local_q = depthwise_conv_s2_nchw(x, params['q_local_w'], params['q_local_b'])
    qpre = local_q + x[:, :, ::2, ::2]                 # AvgPool2d(1, 2, 0) == strided pick
    qpre_flat = qpre.reshape(bsz, DIM, N2).transpose(0, 2, 1)
    x_flat = x.reshape(bsz, DIM, N).transpose(0, 2, 1)
    q = jnp.matmul(qpre_flat, params['wq']) + params['bq']
    k = jnp.matmul(x_flat, params['wk']) + params['bk']
    v = jnp.matmul(x_flat, params['wv']) + params['bv']
    qh = q.reshape(bsz, N2, NUM_HEADS, KEY_DIM).transpose(0, 2, 1, 3)
    kh = k.reshape(bsz, N, NUM_HEADS, KEY_DIM).transpose(0, 2, 1, 3)
    vh = v.reshape(bsz, N, NUM_HEADS, D).transpose(0, 2, 1, 3)
    logits = jnp.einsum('bhqd,bhkd->bhqk', qh, kh) * SCALE + params['attn_bias'][None]
    attn = jax.nn.softmax(logits, axis=-1)
    o = jnp.einsum('bhqk,bhkd->bhqd', attn, vh)
    o = o.transpose(0, 2, 1, 3).reshape(bsz, N2, DH)
    v_nchw = v.transpose(0, 2, 1).reshape(bsz, DH, RESOLUTION, RESOLUTION)
    v_local = depthwise_conv_s2_nchw(v_nchw, params['vloc_w'], params['vloc_b'])
    s = o + v_local.reshape(bsz, DH, N2).transpose(0, 2, 1)
    y = jnp.matmul(jax.nn.gelu(s, approximate=True), params['wp']) + params['bp']
    return y.transpose(0, 2, 1).reshape(bsz, OUT_DIM, RES2, RES2)


if __name__ == "__main__":
    key = jax.random.PRNGKey(0)
    kx, kp_key = jax.random.split(key)
    params = init_params(kp_key)
    x = jax.random.normal(kx, (B, DIM, RESOLUTION, RESOLUTION), jnp.float32)

    kparams = prep_kernel_params(params, B)
    fwd = jax.jit(attention4d_downsample)
    out = jax.block_until_ready(fwd(x, kparams))

    ref = reference(x, params)
    assert out.shape == (B, OUT_DIM, RES2, RES2), out.shape
    np.testing.assert_allclose(np.asarray(out), np.asarray(ref), rtol=2e-2, atol=2e-2)
    print("KERNEL_OK")
</pallas_src>

<mosaic_0001>
module attributes {stable_mosaic.version = 11 : i64} {
  func.func @kernel(%arg0: i32, %arg1: memref<128x32xf32, #tpu.memory_space<vmem>>, %arg2: memref<288x128xf32, #tpu.memory_space<vmem>>, %arg3: memref<9x32xf32, #tpu.memory_space<vmem>>, %arg4: memref<1x32xf32, #tpu.memory_space<vmem>>, %arg5: memref<9x32xf32, #tpu.memory_space<vmem>>, %arg6: memref<1x32xf32, #tpu.memory_space<vmem>>, %arg7: memref<32x16xf32, #tpu.memory_space<vmem>>, %arg8: memref<1x16xf32, #tpu.memory_space<vmem>>, %arg9: memref<32x48xf32, #tpu.memory_space<vmem>>, %arg10: memref<1x48xf32, #tpu.memory_space<vmem>>, %arg11: memref<2x16x64xf32, #tpu.memory_space<vmem>>, %arg12: memref<32x32xf32, #tpu.memory_space<vmem>>, %arg13: memref<1x32xf32, #tpu.memory_space<vmem>>, %arg14: memref<32x32xf32, #tpu.memory_space<vmem>>) attributes {dimension_semantics = [#tpu.dimension_semantics<arbitrary>], iteration_bounds = array<i64: 1>, scalar_prefetch = 0 : i64, scratch_operands = 0 : i64, tpu.core_type = #tpu.core_type<tc>, window_params = [{pipeline_mode = #tpu.pipeline_mode<synchronous>, transform_indices = @transform_0, window_bounds = array<i64: 128, 32>}, {pipeline_mode = #tpu.pipeline_mode<synchronous>, transform_indices = @transform_1, window_bounds = array<i64: 288, 128>}, {pipeline_mode = #tpu.pipeline_mode<synchronous>, transform_indices = @transform_2, window_bounds = array<i64: 9, 32>}, {pipeline_mode = #tpu.pipeline_mode<synchronous>, transform_indices = @transform_3, window_bounds = array<i64: 1, 32>}, {pipeline_mode = #tpu.pipeline_mode<synchronous>, transform_indices = @transform_4, window_bounds = array<i64: 9, 32>}, {pipeline_mode = #tpu.pipeline_mode<synchronous>, transform_indices = @transform_5, window_bounds = array<i64: 1, 32>}, {pipeline_mode = #tpu.pipeline_mode<synchronous>, transform_indices = @transform_6, window_bounds = array<i64: 32, 16>}, {pipeline_mode = #tpu.pipeline_mode<synchronous>, transform_indices = @transform_7, window_bounds = array<i64: 1, 16>}, {pipeline_mode = #tpu.pipeline_mode<synchronous>, transform_indices = @transform_8, window_bounds = array<i64: 32, 48>}, {pipeline_mode = #tpu.pipeline_mode<synchronous>, transform_indices = @transform_9, window_bounds = array<i64: 1, 48>}, {pipeline_mode = #tpu.pipeline_mode<synchronous>, transform_indices = @transform_10, window_bounds = array<i64: 2, 16, 64>}, {pipeline_mode = #tpu.pipeline_mode<synchronous>, transform_indices = @transform_11, window_bounds = array<i64: 32, 32>}, {pipeline_mode = #tpu.pipeline_mode<synchronous>, transform_indices = @transform_12, window_bounds = array<i64: 1, 32>}, {pipeline_mode = #tpu.pipeline_mode<synchronous>, transform_indices = @transform_13, window_bounds = array<i64: 32, 32>}]} {
    %c0 = arith.constant 0 : index
    %c0_0 = arith.constant 0 : index
    %0 = vector.load %arg1[%c0, %c0_0] : memref<128x32xf32, #tpu.memory_space<vmem>>, vector<128x32xf32>
    %c0_1 = arith.constant 0 : index
    %c0_2 = arith.constant 0 : index
    %1 = vector.load %arg9[%c0_1, %c0_2] : memref<32x48xf32, #tpu.memory_space<vmem>>, vector<32x48xf32>
    %cst = arith.constant dense<0.000000e+00> : vector<128x48xf32>
    %2 = tpu.matmul %0, %1, %cst {dimension_numbers = #tpu.dot_dimension_numbers<[1], [0], [0], [1], [0, 0, 1, 1], [], []>} : vector<128x32xf32>, vector<32x48xf32>, vector<128x48xf32> -> vector<128x48xf32>
    %c0_3 = arith.constant 0 : index
    %c0_4 = arith.constant 0 : index
    %3 = vector.load %arg10[%c0_3, %c0_4] : memref<1x48xf32, #tpu.memory_space<vmem>>, vector<1x48xf32>
    %4 = vector.broadcast %3 : vector<1x48xf32> to vector<128x48xf32>
    %5 = arith.addf %2, %4 : vector<128x48xf32>
    %6 = vector.extract_strided_slice %5 {offsets = [0, 0], sizes = [128, 16], strides = [1, 1]} : vector<128x48xf32> to vector<128x16xf32>
    %7 = vector.extract_strided_slice %5 {offsets = [0, 16], sizes = [128, 32], strides = [1, 1]} : vector<128x48xf32> to vector<128x32xf32>
    %c0_5 = arith.constant 0 : index
    %c0_6 = arith.constant 0 : index
    %8 = vector.load %arg2[%c0_5, %c0_6] : memref<288x128xf32, #tpu.memory_space<vmem>>, vector<288x128xf32>
    %cst_7 = arith.constant dense<0.000000e+00> : vector<288x32xf32>
    %9 = tpu.matmul %8, %0, %cst_7 {dimension_numbers = #tpu.dot_dimension_numbers<[1], [0], [0], [1], [0, 0, 1, 1], [], []>} : vector<288x128xf32>, vector<128x32xf32>, vector<288x32xf32> -> vector<288x32xf32>
    %cst_8 = arith.constant dense<0.000000e+00> : vector<288x32xf32>
    %10 = tpu.matmul %8, %7, %cst_8 {dimension_numbers = #tpu.dot_dimension_numbers<[1], [0], [0], [1], [0, 0, 1, 1], [], []>} : vector<288x128xf32>, vector<128x32xf32>, vector<288x32xf32> -> vector<288x32xf32>
    %c0_9 = arith.constant 0 : index
    %c0_10 = arith.constant 0 : index
    %11 = vector.load %arg3[%c0_9, %c0_10] : memref<9x32xf32, #tpu.memory_space<vmem>>, vector<9x32xf32>
    %c0_11 = arith.constant 0 : index
    %c0_12 = arith.constant 0 : index
    %12 = vector.load %arg5[%c0_11, %c0_12] : memref<9x32xf32, #tpu.memory_space<vmem>>, vector<9x32xf32>
    %13 = vector.extract_strided_slice %9 {offsets = [128, 0], sizes = [32, 32], strides = [1, 1]} : vector<288x32xf32> to vector<32x32xf32>
    %cst_13 = arith.constant 0.000000e+00 : f32
    %14 = vector.broadcast %cst_13 : f32 to vector<32x32xf32>
    %15 = vector.extract_strided_slice %9 {offsets = [0, 0], sizes = [32, 32], strides = [1, 1]} : vector<288x32xf32> to vector<32x32xf32>
    %16 = vector.extract_strided_slice %11 {offsets = [0, 0], sizes = [1, 32], strides = [1, 1]} : vector<9x32xf32> to vector<1x32xf32>
    %17 = vector.broadcast %16 : vector<1x32xf32> to vector<32x32xf32>
    %18 = arith.mulf %15, %17 : vector<32x32xf32>
    %19 = arith.addf %13, %18 : vector<32x32xf32>
    %20 = vector.extract_strided_slice %10 {offsets = [0, 0], sizes = [32, 32], strides = [1, 1]} : vector<288x32xf32> to vector<32x32xf32>
    %21 = vector.extract_strided_slice %12 {offsets = [0, 0], sizes = [1, 32], strides = [1, 1]} : vector<9x32xf32> to vector<1x32xf32>
    %22 = vector.broadcast %21 : vector<1x32xf32> to vector<32x32xf32>
    %23 = arith.mulf %20, %22 : vector<32x32xf32>
    %24 = arith.addf %14, %23 : vector<32x32xf32>
    %25 = vector.extract_strided_slice %9 {offsets = [32, 0], sizes = [32, 32], strides = [1, 1]} : vector<288x32xf32> to vector<32x32xf32>
    %26 = vector.extract_strided_slice %11 {offsets = [1, 0], sizes = [1, 32], strides = [1, 1]} : vector<9x32xf32> to vector<1x32xf32>
    %27 = vector.broadcast %26 : vector<1x32xf32> to vector<32x32xf32>
    %28 = arith.mulf %25, %27 : vector<32x32xf32>
    %29 = arith.addf %19, %28 : vector<32x32xf32>
    %30 = vector.extract_strided_slice %10 {offsets = [32, 0], sizes = [32, 32], strides = [1, 1]} : vector<288x32xf32> to vector<32x32xf32>
    %31 = vector.extract_strided_slice %12 {offsets = [1, 0], sizes = [1, 32], strides = [1, 1]} : vector<9x32xf32> to vector<1x32xf32>
    %32 = vector.broadcast %31 : vector<1x32xf32> to vector<32x32xf32>
    %33 = arith.mulf %30, %32 : vector<32x32xf32>
    %34 = arith.addf %24, %33 : vector<32x32xf32>
    %35 = vector.extract_strided_slice %9 {offsets = [64, 0], sizes = [32, 32], strides = [1, 1]} : vector<288x32xf32> to vector<32x32xf32>
    %36 = vector.extract_strided_slice %11 {offsets = [2, 0], sizes = [1, 32], strides = [1, 1]} : vector<9x32xf32> to vector<1x32xf32>
    %37 = vector.broadcast %36 : vector<1x32xf32> to vector<32x32xf32>
    %38 = arith.mulf %35, %37 : vector<32x32xf32>
    %39 = arith.addf %29, %38 : vector<32x32xf32>
    %40 = vector.extract_strided_slice %10 {offsets = [64, 0], sizes = [32, 32], strides = [1, 1]} : vector<288x32xf32> to vector<32x32xf32>
    %41 = vector.extract_strided_slice %12 {offsets = [2, 0], sizes = [1, 32], strides = [1, 1]} : vector<9x32xf32> to vector<1x32xf32>
    %42 = vector.broadcast %41 : vector<1x32xf32> to vector<32x32xf32>
    %43 = arith.mulf %40, %42 : vector<32x32xf32>
    %44 = arith.addf %34, %43 : vector<32x32xf32>
    %45 = vector.extract_strided_slice %9 {offsets = [96, 0], sizes = [32, 32], strides = [1, 1]} : vector<288x32xf32> to vector<32x32xf32>
    %46 = vector.extract_strided_slice %11 {offsets = [3, 0], sizes = [1, 32], strides = [1, 1]} : vector<9x32xf32> to vector<1x32xf32>
    %47 = vector.broadcast %46 : vector<1x32xf32> to vector<32x32xf32>
    %48 = arith.mulf %45, %47 : vector<32x32xf32>
    %49 = arith.addf %39, %48 : vector<32x32xf32>
    %50 = vector.extract_strided_slice %10 {offsets = [96, 0], sizes = [32, 32], strides = [1, 1]} : vector<288x32xf32> to vector<32x32xf32>
    %51 = vector.extract_strided_slice %12 {offsets = [3, 0], sizes = [1, 32], strides = [1, 1]} : vector<9x32xf32> to vector<1x32xf32>
    %52 = vector.broadcast %51 : vector<1x32xf32> to vector<32x32xf32>
    %53 = arith.mulf %50, %52 : vector<32x32xf32>
    %54 = arith.addf %44, %53 : vector<32x32xf32>
    %55 = vector.extract_strided_slice %9 {offsets = [128, 0], sizes = [32, 32], strides = [1, 1]} : vector<288x32xf32> to vector<32x32xf32>
    %56 = vector.extract_strided_slice %11 {offsets = [4, 0], sizes = [1, 32], strides = [1, 1]} : vector<9x32xf32> to vector<1x32xf32>
    %57 = vector.broadcast %56 : vector<1x32xf32> to vector<32x32xf32>
    %58 = arith.mulf %55, %57 : vector<32x32xf32>
    %59 = arith.addf %49, %58 : vector<32x32xf32>
    %60 = vector.extract_strided_slice %10 {offsets = [128, 0], sizes = [32, 32], strides = [1, 1]} : vector<288x32xf32> to vector<32x32xf32>
    %61 = vector.extract_strided_slice %12 {offsets = [4, 0], sizes = [1, 32], strides = [1, 1]} : vector<9x32xf32> to vector<1x32xf32>
    %62 = vector.broadcast %61 : vector<1x32xf32> to vector<32x32xf32>
    %63 = arith.mulf %60, %62 : vector<32x32xf32>
    %64 = arith.addf %54, %63 : vector<32x32xf32>
    %65 = vector.extract_strided_slice %9 {offsets = [160, 0], sizes = [32, 32], strides = [1, 1]} : vector<288x32xf32> to vector<32x32xf32>
    %66 = vector.extract_strided_slice %11 {offsets = [5, 0], sizes = [1, 32], strides = [1, 1]} : vector<9x32xf32> to vector<1x32xf32>
    %67 = vector.broadcast %66 : vector<1x32xf32> to vector<32x32xf32>
    %68 = arith.mulf %65, %67 : vector<32x32xf32>
    %69 = arith.addf %59, %68 : vector<32x32xf32>
    %70 = vector.extract_strided_slice %10 {offsets = [160, 0], sizes = [32, 32], strides = [1, 1]} : vector<288x32xf32> to vector<32x32xf32>
    %71 = vector.extract_strided_slice %12 {offsets = [5, 0], sizes = [1, 32], strides = [1, 1]} : vector<9x32xf32> to vector<1x32xf32>
    %72 = vector.broadcast %71 : vector<1x32xf32> to vector<32x32xf32>
    %73 = arith.mulf %70, %72 : vector<32x32xf32>
    %74 = arith.addf %64, %73 : vector<32x32xf32>
    %75 = vector.extract_strided_slice %9 {offsets = [192, 0], sizes = [32, 32], strides = [1, 1]} : vector<288x32xf32> to vector<32x32xf32>
    %76 = vector.extract_strided_slice %11 {offsets = [6, 0], sizes = [1, 32], strides = [1, 1]} : vector<9x32xf32> to vector<1x32xf32>
    %77 = vector.broadcast %76 : vector<1x32xf32> to vector<32x32xf32>
    %78 = arith.mulf %75, %77 : vector<32x32xf32>
    %79 = arith.addf %69, %78 : vector<32x32xf32>
    %80 = vector.extract_strided_slice %10 {offsets = [192, 0], sizes = [32, 32], strides = [1, 1]} : vector<288x32xf32> to vector<32x32xf32>
    %81 = vector.extract_strided_slice %12 {offsets = [6, 0], sizes = [1, 32], strides = [1, 1]} : vector<9x32xf32> to vector<1x32xf32>
    %82 = vector.broadcast %81 : vector<1x32xf32> to vector<32x32xf32>
    %83 = arith.mulf %80, %82 : vector<32x32xf32>
    %84 = arith.addf %74, %83 : vector<32x32xf32>
    %85 = vector.extract_strided_slice %9 {offsets = [224, 0], sizes = [32, 32], strides = [1, 1]} : vector<288x32xf32> to vector<32x32xf32>
    %86 = vector.extract_strided_slice %11 {offsets = [7, 0], sizes = [1, 32], strides = [1, 1]} : vector<9x32xf32> to vector<1x32xf32>
    %87 = vector.broadcast %86 : vector<1x32xf32> to vector<32x32xf32>
    %88 = arith.mulf %85, %87 : vector<32x32xf32>
    %89 = arith.addf %79, %88 : vector<32x32xf32>
    %90 = vector.extract_strided_slice %10 {offsets = [224, 0], sizes = [32, 32], strides = [1, 1]} : vector<288x32xf32> to vector<32x32xf32>
    %91 = vector.extract_strided_slice %12 {offsets = [7, 0], sizes = [1, 32], strides = [1, 1]} : vector<9x32xf32> to vector<1x32xf32>
    %92 = vector.broadcast %91 : vector<1x32xf32> to vector<32x32xf32>
    %93 = arith.mulf %90, %92 : vector<32x32xf32>
    %94 = arith.addf %84, %93 : vector<32x32xf32>
    %95 = vector.extract_strided_slice %9 {offsets = [256, 0], sizes = [32, 32], strides = [1, 1]} : vector<288x32xf32> to vector<32x32xf32>
    %96 = vector.extract_strided_slice %11 {offsets = [8, 0], sizes = [1, 32], strides = [1, 1]} : vector<9x32xf32> to vector<1x32xf32>
    %97 = vector.broadcast %96 : vector<1x32xf32> to vector<32x32xf32>
    %98 = arith.mulf %95, %97 : vector<32x32xf32>
    %99 = arith.addf %89, %98 : vector<32x32xf32>
    %100 = vector.extract_strided_slice %10 {offsets = [256, 0], sizes = [32, 32], strides = [1, 1]} : vector<288x32xf32> to vector<32x32xf32>
    %101 = vector.extract_strided_slice %12 {offsets = [8, 0], sizes = [1, 32], strides = [1, 1]} : vector<9x32xf32> to vector<1x32xf32>
    %102 = vector.broadcast %101 : vector<1x32xf32> to vector<32x32xf32>
    %103 = arith.mulf %100, %102 : vector<32x32xf32>
    %104 = arith.addf %94, %103 : vector<32x32xf32>
    %c0_14 = arith.constant 0 : index
    %c0_15 = arith.constant 0 : index
    %105 = vector.load %arg4[%c0_14, %c0_15] : memref<1x32xf32, #tpu.memory_space<vmem>>, vector<1x32xf32>
    %106 = vector.broadcast %105 : vector<1x32xf32> to vector<32x32xf32>
    %107 = arith.addf %99, %106 : vector<32x32xf32>
    %c0_16 = arith.constant 0 : index
    %c0_17 = arith.constant 0 : index
    %108 = vector.load %arg6[%c0_16, %c0_17] : memref<1x32xf32, #tpu.memory_space<vmem>>, vector<1x32xf32>
    %109 = vector.broadcast %108 : vector<1x32xf32> to vector<32x32xf32>
    %110 = arith.addf %104, %109 : vector<32x32xf32>
    %c0_18 = arith.constant 0 : index
    %c0_19 = arith.constant 0 : index
    %111 = vector.load %arg7[%c0_18, %c0_19] : memref<32x16xf32, #tpu.memory_space<vmem>>, vector<32x16xf32>
    %cst_20 = arith.constant dense<0.000000e+00> : vector<32x16xf32>
    %112 = tpu.matmul %107, %111, %cst_20 {dimension_numbers = #tpu.dot_dimension_numbers<[1], [0], [0], [1], [0, 0, 1, 1], [], []>} : vector<32x32xf32>, vector<32x16xf32>, vector<32x16xf32> -> vector<32x16xf32>
    %c0_21 = arith.constant 0 : index
    %c0_22 = arith.constant 0 : index
    %113 = vector.load %arg8[%c0_21, %c0_22] : memref<1x16xf32, #tpu.memory_space<vmem>>, vector<1x16xf32>
    %114 = vector.broadcast %113 : vector<1x16xf32> to vector<32x16xf32>
    %115 = arith.addf %112, %114 : vector<32x16xf32>
    %116 = vector.extract_strided_slice %115 {offsets = [0, 0], sizes = [16, 16], strides = [1, 1]} : vector<32x16xf32> to vector<16x16xf32>
    %117 = vector.extract_strided_slice %6 {offsets = [0, 0], sizes = [64, 16], strides = [1, 1]} : vector<128x16xf32> to vector<64x16xf32>
    %118 = vector.extract_strided_slice %7 {offsets = [0, 0], sizes = [64, 32], strides = [1, 1]} : vector<128x32xf32> to vector<64x32xf32>
    %119 = vector.extract_strided_slice %116 {offsets = [0, 0], sizes = [16, 8], strides = [1, 1]} : vector<16x16xf32> to vector<16x8xf32>
    %120 = vector.extract_strided_slice %117 {offsets = [0, 0], sizes = [64, 8], strides = [1, 1]} : vector<64x16xf32> to vector<64x8xf32>
    %121 = vector.extract_strided_slice %118 {offsets = [0, 0], sizes = [64, 16], strides = [1, 1]} : vector<64x32xf32> to vector<64x16xf32>
    %cst_23 = arith.constant dense<0.000000e+00> : vector<16x64xf32>
    %122 = tpu.matmul %119, %120, %cst_23 {dimension_numbers = #tpu.dot_dimension_numbers<[1], [1], [0], [0], [0, 0, 1, 0], [], []>} : vector<16x8xf32>, vector<64x8xf32>, vector<16x64xf32> -> vector<16x64xf32>
    %cst_24 = arith.constant 0.353553385 : f32
    %123 = vector.broadcast %cst_24 : f32 to vector<16x64xf32>
    %124 = arith.mulf %122, %123 : vector<16x64xf32>
    %c0_25 = arith.constant 0 : index
    %c0_26 = arith.constant 0 : index
    %c0_27 = arith.constant 0 : index
    %125 = vector.load %arg11[%c0_25, %c0_26, %c0_27] : memref<2x16x64xf32, #tpu.memory_space<vmem>>, vector<1x16x64xf32>
    %126 = vector.shape_cast %125 : vector<1x16x64xf32> to vector<16x64xf32>
    %127 = arith.addf %124, %126 : vector<16x64xf32>
    %cst_28 = arith.constant dense<0xFF800000> : vector<16xf32>
    %128 = vector.multi_reduction <maximumf>, %127, %cst_28 [1] : vector<16x64xf32> to vector<16xf32>
    %129 = vector.shape_cast %128 : vector<16xf32> to vector<16x1xf32>
    %130 = vector.broadcast %129 : vector<16x1xf32> to vector<16x64xf32>
    %131 = arith.subf %127, %130 : vector<16x64xf32>
    %132 = math.exp %131 : vector<16x64xf32>
    %cst_29 = arith.constant dense<0.000000e+00> : vector<16xf32>
    %133 = vector.multi_reduction <add>, %132, %cst_29 [1] : vector<16x64xf32> to vector<16xf32>
    %134 = vector.shape_cast %133 : vector<16xf32> to vector<16x1xf32>
    %cst_30 = arith.constant dense<0.000000e+00> : vector<16x16xf32>
    %135 = tpu.matmul %132, %121, %cst_30 {dimension_numbers = #tpu.dot_dimension_numbers<[1], [0], [0], [1], [0, 0, 1, 1], [], []>} : vector<16x64xf32>, vector<64x16xf32>, vector<16x16xf32> -> vector<16x16xf32>
    %136 = tpu.reciprocal %134 {approx = true} : vector<16x1xf32> -> vector<16x1xf32>
    %137 = vector.broadcast %136 : vector<16x1xf32> to vector<16x16xf32>
    %138 = arith.mulf %135, %137 : vector<16x16xf32>
    %139 = vector.extract_strided_slice %116 {offsets = [0, 8], sizes = [16, 8], strides = [1, 1]} : vector<16x16xf32> to vector<16x8xf32>
    %140 = vector.extract_strided_slice %117 {offsets = [0, 8], sizes = [64, 8], strides = [1, 1]} : vector<64x16xf32> to vector<64x8xf32>
    %141 = vector.extract_strided_slice %118 {offsets = [0, 16], sizes = [64, 16], strides = [1, 1]} : vector<64x32xf32> to vector<64x16xf32>
    %cst_31 = arith.constant dense<0.000000e+00> : vector<16x64xf32>
    %142 = tpu.matmul %139, %140, %cst_31 {dimension_numbers = #tpu.dot_dimension_numbers<[1], [1], [0], [0], [0, 0, 1, 0], [], []>} : vector<16x8xf32>, vector<64x8xf32>, vector<16x64xf32> -> vector<16x64xf32>
    %cst_32 = arith.constant 0.353553385 : f32
    %143 = vector.broadcast %cst_32 : f32 to vector<16x64xf32>
    %144 = arith.mulf %142, %143 : vector<16x64xf32>
    %c1 = arith.constant 1 : index
    %c0_33 = arith.constant 0 : index
    %c0_34 = arith.constant 0 : index
    %145 = vector.load %arg11[%c1, %c0_33, %c0_34] : memref<2x16x64xf32, #tpu.memory_space<vmem>>, vector<1x16x64xf32>
    %146 = vector.shape_cast %145 : vector<1x16x64xf32> to vector<16x64xf32>
    %147 = arith.addf %144, %146 : vector<16x64xf32>
    %cst_35 = arith.constant dense<0xFF800000> : vector<16xf32>
    %148 = vector.multi_reduction <maximumf>, %147, %cst_35 [1] : vector<16x64xf32> to vector<16xf32>
    %149 = vector.shape_cast %148 : vector<16xf32> to vector<16x1xf32>
    %150 = vector.broadcast %149 : vector<16x1xf32> to vector<16x64xf32>
    %151 = arith.subf %147, %150 : vector<16x64xf32>
    %152 = math.exp %151 : vector<16x64xf32>
    %cst_36 = arith.constant dense<0.000000e+00> : vector<16xf32>
    %153 = vector.multi_reduction <add>, %152, %cst_36 [1] : vector<16x64xf32> to vector<16xf32>
    %154 = vector.shape_cast %153 : vector<16xf32> to vector<16x1xf32>
    %cst_37 = arith.constant dense<0.000000e+00> : vector<16x16xf32>
    %155 = tpu.matmul %152, %141, %cst_37 {dimension_numbers = #tpu.dot_dimension_numbers<[1], [0], [0], [1], [0, 0, 1, 1], [], []>} : vector<16x64xf32>, vector<64x16xf32>, vector<16x16xf32> -> vector<16x16xf32>
    %156 = tpu.reciprocal %154 {approx = true} : vector<16x1xf32> -> vector<16x1xf32>
    %157 = vector.broadcast %156 : vector<16x1xf32> to vector<16x16xf32>
    %158 = arith.mulf %155, %157 : vector<16x16xf32>
    %159 = tpu.concatenate %138, %158 in 1 : vector<16x16xf32>, vector<16x16xf32> -> vector<16x32xf32>
    %160 = vector.extract_strided_slice %115 {offsets = [16, 0], sizes = [16, 16], strides = [1, 1]} : vector<32x16xf32> to vector<16x16xf32>
    %161 = vector.extract_strided_slice %6 {offsets = [64, 0], sizes = [64, 16], strides = [1, 1]} : vector<128x16xf32> to vector<64x16xf32>
    %162 = vector.extract_strided_slice %7 {offsets = [64, 0], sizes = [64, 32], strides = [1, 1]} : vector<128x32xf32> to vector<64x32xf32>
    %163 = vector.extract_strided_slice %160 {offsets = [0, 0], sizes = [16, 8], strides = [1, 1]} : vector<16x16xf32> to vector<16x8xf32>
    %164 = vector.extract_strided_slice %161 {offsets = [0, 0], sizes = [64, 8], strides = [1, 1]} : vector<64x16xf32> to vector<64x8xf32>
    %165 = vector.extract_strided_slice %162 {offsets = [0, 0], sizes = [64, 16], strides = [1, 1]} : vector<64x32xf32> to vector<64x16xf32>
    %cst_38 = arith.constant dense<0.000000e+00> : vector<16x64xf32>
    %166 = tpu.matmul %163, %164, %cst_38 {dimension_numbers = #tpu.dot_dimension_numbers<[1], [1], [0], [0], [0, 0, 1, 0], [], []>} : vector<16x8xf32>, vector<64x8xf32>, vector<16x64xf32> -> vector<16x64xf32>
    %cst_39 = arith.constant 0.353553385 : f32
    %167 = vector.broadcast %cst_39 : f32 to vector<16x64xf32>
    %168 = arith.mulf %166, %167 : vector<16x64xf32>
    %c0_40 = arith.constant 0 : index
    %c0_41 = arith.constant 0 : index
    %c0_42 = arith.constant 0 : index
    %169 = vector.load %arg11[%c0_40, %c0_41, %c0_42] : memref<2x16x64xf32, #tpu.memory_space<vmem>>, vector<1x16x64xf32>
    %170 = vector.shape_cast %169 : vector<1x16x64xf32> to vector<16x64xf32>
    %171 = arith.addf %168, %170 : vector<16x64xf32>
    %cst_43 = arith.constant dense<0xFF800000> : vector<16xf32>
    %172 = vector.multi_reduction <maximumf>, %171, %cst_43 [1] : vector<16x64xf32> to vector<16xf32>
    %173 = vector.shape_cast %172 : vector<16xf32> to vector<16x1xf32>
    %174 = vector.broadcast %173 : vector<16x1xf32> to vector<16x64xf32>
    %175 = arith.subf %171, %174 : vector<16x64xf32>
    %176 = math.exp %175 : vector<16x64xf32>
    %cst_44 = arith.constant dense<0.000000e+00> : vector<16xf32>
    %177 = vector.multi_reduction <add>, %176, %cst_44 [1] : vector<16x64xf32> to vector<16xf32>
    %178 = vector.shape_cast %177 : vector<16xf32> to vector<16x1xf32>
    %cst_45 = arith.constant dense<0.000000e+00> : vector<16x16xf32>
    %179 = tpu.matmul %176, %165, %cst_45 {dimension_numbers = #tpu.dot_dimension_numbers<[1], [0], [0], [1], [0, 0, 1, 1], [], []>} : vector<16x64xf32>, vector<64x16xf32>, vector<16x16xf32> -> vector<16x16xf32>
    %180 = tpu.reciprocal %178 {approx = true} : vector<16x1xf32> -> vector<16x1xf32>
    %181 = vector.broadcast %180 : vector<16x1xf32> to vector<16x16xf32>
    %182 = arith.mulf %179, %181 : vector<16x16xf32>
    %183 = vector.extract_strided_slice %160 {offsets = [0, 8], sizes = [16, 8], strides = [1, 1]} : vector<16x16xf32> to vector<16x8xf32>
    %184 = vector.extract_strided_slice %161 {offsets = [0, 8], sizes = [64, 8], strides = [1, 1]} : vector<64x16xf32> to vector<64x8xf32>
    %185 = vector.extract_strided_slice %162 {offsets = [0, 16], sizes = [64, 16], strides = [1, 1]} : vector<64x32xf32> to vector<64x16xf32>
    %cst_46 = arith.constant dense<0.000000e+00> : vector<16x64xf32>
    %186 = tpu.matmul %183, %184, %cst_46 {dimension_numbers = #tpu.dot_dimension_numbers<[1], [1], [0], [0], [0, 0, 1, 0], [], []>} : vector<16x8xf32>, vector<64x8xf32>, vector<16x64xf32> -> vector<16x64xf32>
    %cst_47 = arith.constant 0.353553385 : f32
    %187 = vector.broadcast %cst_47 : f32 to vector<16x64xf32>
    %188 = arith.mulf %186, %187 : vector<16x64xf32>
    %c1_48 = arith.constant 1 : index
    %c0_49 = arith.constant 0 : index
    %c0_50 = arith.constant 0 : index
    %189 = vector.load %arg11[%c1_48, %c0_49, %c0_50] : memref<2x16x64xf32, #tpu.memory_space<vmem>>, vector<1x16x64xf32>
    %190 = vector.shape_cast %189 : vector<1x16x64xf32> to vector<16x64xf32>
    %191 = arith.addf %188, %190 : vector<16x64xf32>
    %cst_51 = arith.constant dense<0xFF800000> : vector<16xf32>
    %192 = vector.multi_reduction <maximumf>, %191, %cst_51 [1] : vector<16x64xf32> to vector<16xf32>
    %193 = vector.shape_cast %192 : vector<16xf32> to vector<16x1xf32>
    %194 = vector.broadcast %193 : vector<16x1xf32> to vector<16x64xf32>
    %195 = arith.subf %191, %194 : vector<16x64xf32>
    %196 = math.exp %195 : vector<16x64xf32>
    %cst_52 = arith.constant dense<0.000000e+00> : vector<16xf32>
    %197 = vector.multi_reduction <add>, %196, %cst_52 [1] : vector<16x64xf32> to vector<16xf32>
    %198 = vector.shape_cast %197 : vector<16xf32> to vector<16x1xf32>
    %cst_53 = arith.constant dense<0.000000e+00> : vector<16x16xf32>
    %199 = tpu.matmul %196, %185, %cst_53 {dimension_numbers = #tpu.dot_dimension_numbers<[1], [0], [0], [1], [0, 0, 1, 1], [], []>} : vector<16x64xf32>, vector<64x16xf32>, vector<16x16xf32> -> vector<16x16xf32>
    %200 = tpu.reciprocal %198 {approx = true} : vector<16x1xf32> -> vector<16x1xf32>
    %201 = vector.broadcast %200 : vector<16x1xf32> to vector<16x16xf32>
    %202 = arith.mulf %199, %201 : vector<16x16xf32>
    %203 = tpu.concatenate %182, %202 in 1 : vector<16x16xf32>, vector<16x16xf32> -> vector<16x32xf32>
    %204 = tpu.concatenate %159, %203 in 0 : vector<16x32xf32>, vector<16x32xf32> -> vector<32x32xf32>
    %205 = arith.addf %204, %110 : vector<32x32xf32>
    %206 = arith.mulf %205, %205 : vector<32x32xf32>
    %207 = arith.mulf %205, %206 : vector<32x32xf32>
    %cst_54 = arith.constant 4.471500e-02 : f32
    %208 = vector.broadcast %cst_54 : f32 to vector<32x32xf32>
    %209 = arith.mulf %208, %207 : vector<32x32xf32>
    %210 = arith.addf %205, %209 : vector<32x32xf32>
    %cst_55 = arith.constant 0.797884583 : f32
    %211 = vector.broadcast %cst_55 : f32 to vector<32x32xf32>
    %212 = arith.mulf %211, %210 : vector<32x32xf32>
    %213 = math.tanh %212 : vector<32x32xf32>
    %cst_56 = arith.constant 1.000000e+00 : f32
    %214 = vector.broadcast %cst_56 : f32 to vector<32x32xf32>
    %215 = arith.addf %214, %213 : vector<32x32xf32>
    %cst_57 = arith.constant 5.000000e-01 : f32
    %216 = vector.broadcast %cst_57 : f32 to vector<32x32xf32>
    %217 = arith.mulf %216, %215 : vector<32x32xf32>
    %218 = arith.mulf %205, %217 : vector<32x32xf32>
    %c0_58 = arith.constant 0 : index
    %c0_59 = arith.constant 0 : index
    %219 = vector.load %arg12[%c0_58, %c0_59] : memref<32x32xf32, #tpu.memory_space<vmem>>, vector<32x32xf32>
    %cst_60 = arith.constant dense<0.000000e+00> : vector<32x32xf32>
    %220 = tpu.matmul %218, %219, %cst_60 {dimension_numbers = #tpu.dot_dimension_numbers<[1], [0], [0], [1], [0, 0, 1, 1], [], []>} : vector<32x32xf32>, vector<32x32xf32>, vector<32x32xf32> -> vector<32x32xf32>
    %c0_61 = arith.constant 0 : index
    %c0_62 = arith.constant 0 : index
    %221 = vector.load %arg13[%c0_61, %c0_62] : memref<1x32xf32, #tpu.memory_space<vmem>>, vector<1x32xf32>
    %222 = vector.broadcast %221 : vector<1x32xf32> to vector<32x32xf32>
    %223 = arith.addf %220, %222 : vector<32x32xf32>
    %c0_63 = arith.constant 0 : index
    %c0_64 = arith.constant 0 : index
    %224 = vector.load %arg14[%c0_63, %c0_64] : memref<32x32xf32, #tpu.memory_space<vmem>>, vector<32x32xf32>
    tpu.vector_store %arg14[%c0_63, %c0_64], %223 {strides = array<i32>} : memref<32x32xf32, #tpu.memory_space<vmem>>, vector<32x32xf32>,
    return
  }
  func.func @transform_0(%arg0: i32) -> (i32, i32) {
    %c0_i32 = arith.constant 0 : i32
    %c0_i32_0 = arith.constant 0 : i32
    %c0_i32_1 = arith.constant 0 : i32
    return %c0_i32, %c0_i32_0 : i32, i32
  }
  func.func @transform_1(%arg0: i32) -> (i32, i32) {
    %c0_i32 = arith.constant 0 : i32
    %c0_i32_0 = arith.constant 0 : i32
    %c0_i32_1 = arith.constant 0 : i32
    return %c0_i32, %c0_i32_0 : i32, i32
  }
  func.func @transform_2(%arg0: i32) -> (i32, i32) {
    %c0_i32 = arith.constant 0 : i32
    %c0_i32_0 = arith.constant 0 : i32
    %c0_i32_1 = arith.constant 0 : i32
    return %c0_i32, %c0_i32_0 : i32, i32
  }
  func.func @transform_3(%arg0: i32) -> (i32, i32) {
    %c0_i32 = arith.constant 0 : i32
    %c0_i32_0 = arith.constant 0 : i32
    %c0_i32_1 = arith.constant 0 : i32
    return %c0_i32, %c0_i32_0 : i32, i32
  }
  func.func @transform_4(%arg0: i32) -> (i32, i32) {
    %c0_i32 = arith.constant 0 : i32
    %c0_i32_0 = arith.constant 0 : i32
    %c0_i32_1 = arith.constant 0 : i32
    return %c0_i32, %c0_i32_0 : i32, i32
  }
  func.func @transform_5(%arg0: i32) -> (i32, i32) {
    %c0_i32 = arith.constant 0 : i32
    %c0_i32_0 = arith.constant 0 : i32
    %c0_i32_1 = arith.constant 0 : i32
    return %c0_i32, %c0_i32_0 : i32, i32
  }
  func.func @transform_6(%arg0: i32) -> (i32, i32) {
    %c0_i32 = arith.constant 0 : i32
    %c0_i32_0 = arith.constant 0 : i32
    %c0_i32_1 = arith.constant 0 : i32
    return %c0_i32, %c0_i32_0 : i32, i32
  }
  func.func @transform_7(%arg0: i32) -> (i32, i32) {
    %c0_i32 = arith.constant 0 : i32
    %c0_i32_0 = arith.constant 0 : i32
    %c0_i32_1 = arith.constant 0 : i32
    return %c0_i32, %c0_i32_0 : i32, i32
  }
  func.func @transform_8(%arg0: i32) -> (i32, i32) {
    %c0_i32 = arith.constant 0 : i32
    %c0_i32_0 = arith.constant 0 : i32
    %c0_i32_1 = arith.constant 0 : i32
    return %c0_i32, %c0_i32_0 : i32, i32
  }
  func.func @transform_9(%arg0: i32) -> (i32, i32) {
    %c0_i32 = arith.constant 0 : i32
    %c0_i32_0 = arith.constant 0 : i32
    %c0_i32_1 = arith.constant 0 : i32
    return %c0_i32, %c0_i32_0 : i32, i32
  }
  func.func @transform_10(%arg0: i32) -> (i32, i32, i32) {
    %c0_i32 = arith.constant 0 : i32
    %c0_i32_0 = arith.constant 0 : i32
    %c0_i32_1 = arith.constant 0 : i32
    %c0_i32_2 = arith.constant 0 : i32
    return %c0_i32, %c0_i32_0, %c0_i32_1 : i32, i32, i32
  }
  func.func @transform_11(%arg0: i32) -> (i32, i32) {
    %c0_i32 = arith.constant 0 : i32
    %c0_i32_0 = arith.constant 0 : i32
    %c0_i32_1 = arith.constant 0 : i32
    return %c0_i32, %c0_i32_0 : i32, i32
  }
  func.func @transform_12(%arg0: i32) -> (i32, i32) {
    %c0_i32 = arith.constant 0 : i32
    %c0_i32_0 = arith.constant 0 : i32
    %c0_i32_1 = arith.constant 0 : i32
    return %c0_i32, %c0_i32_0 : i32, i32
  }
  func.func @transform_13(%arg0: i32) -> (i32, i32) {
    %c0_i32 = arith.constant 0 : i32
    %c0_i32_0 = arith.constant 0 : i32
    %c0_i32_1 = arith.constant 0 : i32
    return %c0_i32, %c0_i32_0 : i32, i32
  }
}

</mosaic_0001>

<bundles_post_ra>
// kernel: attention4d_downsample.1
= control target key start
LH: loop header
LB: loop body
LE: loop exit
PB: predicated region body
PF: predicated region fallthrough
CT: control target
= control target key end

     0   :  { %18 = vsyncpa [#allocation3], 0  ;;  %s4568_s0 = inlined_call_operand.hbm [shape: f32[128,32], index: 0, kind: input, shape index: {}]   ;;  %s4569_s1 = inlined_call_operand.hbm [shape: f32[288,128], index: 1, kind: input, shape index: {}]   ;;  %s4570_s2 = inlined_call_operand.hbm [shape: f32[9,32], index: 2, kind: input, shape index: {}]   ;;  %s4571_s3 = inlined_call_operand.vmem [shape: f32[1,32], index: 3, kind: input, shape index: {}]   ;;  %s4572_s4 = inlined_call_operand.vmem [shape: f32[9,32], index: 4, kind: input, shape index: {}]   ;;  %s4573_s5 = inlined_call_operand.hbm [shape: f32[1,32], index: 5, kind: input, shape index: {}]   ;;  %s4574_s6 = inlined_call_operand.vmem [shape: f32[32,16], index: 6, kind: input, shape index: {}]   ;;  %s4575_s7 = inlined_call_operand.hbm [shape: f32[1,16], index: 7, kind: input, shape index: {}]   ;;  %s4576_s8 = inlined_call_operand.vmem [shape: f32[32,48], index: 8, kind: input, shape index: {}]   ;;  %s4577_s9 = inlined_call_operand.hbm [shape: f32[1,48], index: 9, kind: input, shape index: {}]   ;;  %s4578_s10 = inlined_call_operand.hbm [shape: f32[2,16,64], index: 10, kind: input, shape index: {}]   ;;  %s4579_s11 = inlined_call_operand.vmem [shape: f32[32,32], index: 11, kind: input, shape index: {}]   ;;  %s4580_s12 = inlined_call_operand.hbm [shape: f32[1,32], index: 12, kind: input, shape index: {}]   ;;  %s4581_s13 = inlined_call_operand.hbm [shape: f32[32,32], index: 13, kind: output, shape index: {}]  }
   0x1   :  { %19 = vsyncpa [#allocation6], 0 }
   0x2   :  { %20 = vsyncpa [#allocation9], 0 }
   0x3   :  { %21 = vsyncpa [#allocation12], 0 }
   0x4   :  { %22 = vsyncpa [#allocation15], 0 }
   0x5   :  { %23 = vsyncpa [#allocation4], 0  ;;  %s3724_s25 = smov [#allocation5]   ;;  %s3725_s27 = smov [#allocation8]  }
   0x6   :  { %s41_s26 = sshll.u32 %s3724_s25, 4  ;;  %s70_s28 = sshll.u32 %s3725_s27, 4  ;;  %s42_s26 = int_to_ptr.vmem [resolvable:$true] %s41_s26  ;;  %s3809_s28 = int_to_ptr.vmem [resolvable:$true] %s70_s28 }
   0x7   :  { %s3514_s14 = scalar_lea.hbm %s4569_s1, 4608 }
   0x8   :  { %p3515_p0 = scmp.ne.s32.totalorder %s4569_s1, %s3514_s14  ;;  %p3518_p1 = scmp.lt.u32.totalorder %s3514_s14, %s4569_s1 }
   0xa   :  { %p3520_p2 = pnand %p3518_p1, %p3515_p0 }
   0xc   :  { %3523 = shalt.err (!%p3520_p2)
}
   0xd   :  { %s3524_s19 = scalar_lea.vmem %s42_s26, 4608  ;;  %p3529_p4 = scmp.lt.s32.totalorder %s42_s26, %s42_s26 }
   0xe   :  { %p3525_p3 = scmp.ne.s32.totalorder %s42_s26, %s3524_s19  ;;  %p3530_p5 = scmp.lt.s32.totalorder %s3524_s19, %s3524_s19 }
  0x10   :  { %p3531_p6 = por %p3530_p5, %p3529_p4 }
  0x12   :  { %p3532_p7 = pnand %p3531_p6, %p3525_p3 }
  0x14   :  { %3535 = shalt.err (!%p3532_p7)
}
  0x15   :  { %s3726_s20 = smov 128   ;;  %s3727_s21 = smov 8  }
  0x16   :  { %47 = dma.hbm_to_vmem [thread:$0]  %s4569_s1, 4608, %s42_s26, [#allocation6], %s3726_s20, %s3726_s20, %s3727_s21  }
  0x17   :  { %s3536_s27 = scalar_lea.hbm %s4573_s5, 16 }
  0x18   :  { %p3537_p8 = scmp.ne.s32.totalorder %s4573_s5, %s3536_s27  ;;  %p3540_p9 = scmp.lt.u32.totalorder %s3536_s27, %s4573_s5 }
  0x1a   :  { %p3542_p10 = pnand %p3540_p9, %p3537_p8 }
  0x1c   :  { %3545 = shalt.err (!%p3542_p10)
}
  0x1d   :  { %s3546_s16 = scalar_lea.vmem %s3809_s28, 16  ;;  %s3550_s1 = scalar_lea.vmem %s3809_s28, 32 }
  0x1e   :  { %p3547_p11 = scmp.ne.s32.totalorder %s3809_s28, %s3546_s16  ;;  %p3551_p12 = scmp.lt.s32.totalorder %s3809_s28, %s3809_s28 }
  0x1f   :  { %p3552_p13 = scmp.lt.s32.totalorder %s3550_s1, %s3546_s16 }
  0x21   :  { %p3553_p0 = por %p3552_p13, %p3551_p12 }
  0x23   :  { %p3554_p1 = pnand %p3553_p0, %p3547_p11 }
  0x25   :  { %3557 = shalt.err (!%p3554_p1)
}
  0x26   :  { %73 = dma.hbm_to_vmem [thread:$0]  %s4573_s5, 16, %s3809_s28, [#allocation9]  }
  0x27   :  { %s3728_s18 = smov [#allocation11]   ;;  %s3729_s22 = smov [#allocation2]  }
  0x28   :  { %s94_s19 = sshll.u32 %s3728_s18, 4  ;;  %s29_s23 = sshll.u32 %s3729_s22, 4  ;;  %s95_s19 = int_to_ptr.vmem [resolvable:$true] %s94_s19  ;;  %s3844_s23 = int_to_ptr.vmem [resolvable:$true] %s29_s23 }
  0x29   :  { %s3558_s27 = scalar_lea.hbm %s4577_s9, 16 }
  0x2a   :  { %p3559_p2 = scmp.ne.s32.totalorder %s4577_s9, %s3558_s27  ;;  %p3562_p3 = scmp.lt.u32.totalorder %s3558_s27, %s4577_s9 }
  0x2c   :  { %p3564_p4 = pnand %p3562_p3, %p3559_p2 }
  0x2e   :  { %3567 = shalt.err (!%p3564_p4)
}
  0x2f   :  { %s3568_s5 = scalar_lea.vmem %s95_s19, 16  ;;  %s3572_s28 = scalar_lea.vmem %s95_s19, 32 }
  0x30   :  { %p3569_p5 = scmp.ne.s32.totalorder %s95_s19, %s3568_s5  ;;  %p3573_p6 = scmp.lt.s32.totalorder %s95_s19, %s95_s19 }
  0x31   :  { %p3574_p7 = scmp.lt.s32.totalorder %s3572_s28, %s3568_s5 }
  0x33   :  { %p3575_p8 = por %p3574_p7, %p3573_p6 }
  0x35   :  { %p3576_p9 = pnand %p3575_p8, %p3569_p5 }
  0x37   :  { %3579 = shalt.err (!%p3576_p9)
}
  0x38   :  { %97 = dma.hbm_to_vmem [thread:$0]  %s4577_s9, 16, %s95_s19, [#allocation12]  }
  0x39   :  { %s3580_s18 = scalar_lea.hbm %s4568_s0, 2048 }
  0x3a   :  { %p3581_p10 = scmp.ne.s32.totalorder %s4568_s0, %s3580_s18  ;;  %p3584_p11 = scmp.lt.u32.totalorder %s3580_s18, %s4568_s0 }
  0x3c   :  { %p3586_p12 = pnand %p3584_p11, %p3581_p10 }
  0x3e   :  { %3589 = shalt.err (!%p3586_p12)
}
  0x3f   :  { %s3590_s29 = scalar_lea.vmem %s3844_s23, 2048  ;;  %p3595_p0 = scmp.lt.s32.totalorder %s3844_s23, %s3844_s23 }
  0x40   :  { %p3591_p13 = scmp.ne.s32.totalorder %s3844_s23, %s3590_s29  ;;  %p3596_p1 = scmp.lt.s32.totalorder %s3590_s29, %s3590_s29 }
  0x42   :  { %p3597_p2 = por %p3596_p1, %p3595_p0 }
  0x44   :  { %p3598_p3 = pnand %p3597_p2, %p3591_p13 }
  0x46   :  { %3601 = shalt.err (!%p3598_p3)
}
  0x47   :  { %35 = dma.hbm_to_vmem [thread:$0]  %s4568_s0, 2048, %s3844_s23, [#allocation3], %s3726_s20, %s3726_s20, %s3727_s21  }
  0x48   :  { %s3730_s30 = smov [#allocation7]   ;;  %s3731_s15 = smov [#allocation10]  }
  0x49   :  { %s53_s14 = sshll.u32 %s3730_s30, 4  ;;  %s82_s5 = sshll.u32 %s3731_s15, 4  ;;  %s54_s14 = int_to_ptr.vmem [resolvable:$true] %s53_s14  ;;  %s83_s5 = int_to_ptr.vmem [resolvable:$true] %s82_s5 }
  0x4a   :  { %s3602_s1 = scalar_lea.hbm %s4570_s2, 256 }
  0x4b   :  { %p3603_p4 = scmp.ne.s32.totalorder %s4570_s2, %s3602_s1  ;;  %p3606_p5 = scmp.lt.u32.totalorder %s3602_s1, %s4570_s2 }
  0x4d   :  { %p3608_p6 = pnand %p3606_p5, %p3603_p4 }
  0x4f   :  { %3611 = shalt.err (!%p3608_p6)
}
  0x50   :  { %s3612_s0 = scalar_lea.vmem %s54_s14, 256  ;;  %p3617_p8 = scmp.lt.s32.totalorder %s54_s14, %s54_s14 }
  0x51   :  { %p3613_p7 = scmp.ne.s32.totalorder %s54_s14, %s3612_s0  ;;  %p3618_p9 = scmp.lt.s32.totalorder %s3612_s0, %s3612_s0 }
  0x53   :  { %p3619_p10 = por %p3618_p9, %p3617_p8 }
  0x55   :  { %p3620_p11 = pnand %p3619_p10, %p3613_p7 }
  0x57   :  { %3623 = shalt.err (!%p3620_p11)
}
  0x58   :  { %59 = dma.hbm_to_vmem [thread:$0]  %s4570_s2, 256, %s54_s14, [#allocation6], %s3726_s20, %s3726_s20, %s3727_s21  }
  0x59   :  { %s3624_s29 = scalar_lea.hbm %s4575_s7, 16 }
  0x5a   :  { %p3625_p12 = scmp.ne.s32.totalorder %s4575_s7, %s3624_s29  ;;  %p3628_p13 = scmp.lt.u32.totalorder %s3624_s29, %s4575_s7 }
  0x5c   :  { %p3630_p0 = pnand %p3628_p13, %p3625_p12 }
  0x5e   :  { %3633 = shalt.err (!%p3630_p0)
}
  0x5f   :  { %s3634_s28 = scalar_lea.vmem %s83_s5, 16  ;;  %s3638_s16 = scalar_lea.vmem %s83_s5, 32 }
  0x60   :  { %p3635_p1 = scmp.ne.s32.totalorder %s83_s5, %s3634_s28  ;;  %p3639_p2 = scmp.lt.s32.totalorder %s83_s5, %s83_s5 }
  0x61   :  { %p3640_p3 = scmp.lt.s32.totalorder %s3638_s16, %s3634_s28 }
  0x63   :  { %p3641_p4 = por %p3640_p3, %p3639_p2 }
  0x65   :  { %p3642_p5 = pnand %p3641_p4, %p3635_p1 }
  0x67   :  { %3645 = shalt.err (!%p3642_p5)
}
  0x68   :  { %85 = dma.hbm_to_vmem [thread:$0]  %s4575_s7, 16, %s83_s5, [#allocation9]  }
  0x69   :  { %s3732_s1 = smov [#allocation13]   ;;  %s3733_s17 = smov [#allocation14]  }
  0x6a   :  { %s103_s26 = sshll.u32 %s3732_s1, 4  ;;  %s118_s18 = sshll.u32 %s3733_s17, 4  ;;  %s104_s26 = int_to_ptr.vmem [resolvable:$true] %s103_s26  ;;  %s119_s18 = int_to_ptr.vmem [resolvable:$true] %s118_s18 }
  0x6b   :  { %s3646_s23 = scalar_lea.hbm %s4578_s10, 512 }
  0x6c   :  { %p3647_p6 = scmp.ne.s32.totalorder %s4578_s10, %s3646_s23  ;;  %p3650_p7 = scmp.lt.u32.totalorder %s3646_s23, %s4578_s10 }
  0x6e   :  { %p3652_p8 = pnand %p3650_p7, %p3647_p6 }
  0x70   :  { %3655 = shalt.err (!%p3652_p8)
}
  0x71   :  { %s3656_s7 = scalar_lea.vmem %s104_s26, 512  ;;  %p3661_p10 = scmp.lt.s32.totalorder %s104_s26, %s104_s26 }
  0x72   :  { %p3657_p9 = scmp.ne.s32.totalorder %s104_s26, %s3656_s7  ;;  %p3662_p11 = scmp.lt.s32.totalorder %s3656_s7, %s3656_s7 }
  0x74   :  { %p3663_p12 = por %p3662_p11, %p3661_p10 }
  0x76   :  { %p3664_p13 = pnand %p3663_p12, %p3657_p9 }
  0x78   :  { %3667 = shalt.err (!%p3664_p13)
}
  0x79   :  { %109 = dma.hbm_to_vmem [thread:$0]  %s4578_s10, 512, %s104_s26, [#allocation12], %s3726_s20, %s3726_s20, %s3727_s21  }
  0x7a   :  { %s3668_s15 = scalar_lea.hbm %s4580_s12, 16 }
  0x7b   :  { %p3669_p0 = scmp.ne.s32.totalorder %s4580_s12, %s3668_s15  ;;  %p3672_p1 = scmp.lt.u32.totalorder %s3668_s15, %s4580_s12 }
  0x7d   :  { %p3674_p2 = pnand %p3672_p1, %p3669_p0 }
  0x7f   :  { %3677 = shalt.err (!%p3674_p2)
}
  0x80   :  { %s3678_s1 = scalar_lea.vmem %s119_s18, 16  ;;  %s3682_s17 = scalar_lea.vmem %s119_s18, 32 }
  0x81   :  { %p3679_p3 = scmp.ne.s32.totalorder %s119_s18, %s3678_s1  ;;  %p3683_p4 = scmp.lt.s32.totalorder %s119_s18, %s119_s18 }
  0x82   :  { %p3684_p5 = scmp.lt.s32.totalorder %s3682_s17, %s3678_s1 }
  0x84   :  { %p3685_p6 = por %p3684_p5, %p3683_p4 }
  0x86   :  { %p3686_p7 = pnand %p3685_p6, %p3679_p3 }
  0x88   :  { %3689 = shalt.err (!%p3686_p7)
}
  0x89   :  { %121 = dma.hbm_to_vmem [thread:$0]  %s4580_s12, 16, %s119_s18, [#allocation15]  }
  0x8a   :  { %3712 = dma.done.wait [#allocation3], 2048  }
  0x8b   :  { %3713 = vsyncadd [#allocation3], 4294965248 }
  0x8c   :  { %3714 = dma.done.wait [#allocation6], 4864  }
  0x8d   :  { %3715 = vsyncadd [#allocation6], 4294962432 }
  0x8e   :  { %3716 = dma.done.wait [#allocation9], 32  }
  0x8f   :  { %3717 = vsyncadd [#allocation9], 4294967264 }
  0x90   :  { %3718 = dma.done.wait [#allocation12], 528  }
  0x91   :  { %3719 = vsyncadd [#allocation12], 4294966768 }
  0x92   :  { %3720 = dma.done.wait [#allocation15], 16  }
  0x93   :  { %3721 = vsyncadd [#allocation15], 4294967280  ;;  %vm173_vm0 = vcmask 261120   ;;  %v162_v0 = vld [vmem:[%s4576_s8] sm:$0xff]  ;;  %v163_v1 = vld [vmem:[%s4576_s8 + $0x8] sm:$0xff]  ;;  %s3734_s28 = smov 112  }
  0x94   :  { %v146_v2 = vld [vmem:[#allocation2] sm:$0xff]  ;;  %v3091_v3 = vpack.c.bf16 %v163_v1, %v162_v0  ;;  %v147_v4 = vld [vmem:[#allocation2 + $0x8] sm:$0xff]  ;;  %v164_v5 = vld [vmem:[%s4576_s8 + $0x10] sm:$0xff]  ;;  %vm1307_vm1 = vcmask 64512   ;;  %vm1411_vm3 = vcmask 523264   ;;  %vm1772_vm4 = vcmask 130048  }
  0x95   :  { %v165_v6 = vld [vmem:[%s4576_s8 + $0x18] sm:$0xff]  ;;  %2715 = vmatprep.mubr.msk.f32.mxu0 %vm173_vm0, %v146_v2  ;;  %v3099_v7 = vpack.c.bf16 %v147_v4, %v146_v2  ;;  %v148_v9 = vld [vmem:[#allocation2 + $0x10] sm:$0xff]  ;;  %v150_v12 = vld [vmem:[#allocation2 + $0x20] sm:$0xff] }
  0x96   :  { %v3095_v8 = vpack.c.bf16 %v165_v6, %v164_v5  ;;  %v149_v10 = vld [vmem:[#allocation2 + $0x18] sm:$0xff]  ;;  %3092 = vmatprep.subr.bf16.mxu0 %v3091_v3  ;;  %v151_v13 = vld [vmem:[#allocation2 + $0x28] sm:$0xff]  ;;  %v367_v15 = vld [vmem:[#allocation5] sm:$0xff] }
  0x97   :  { %v3103_v11 = vpack.c.bf16 %v149_v10, %v148_v9  ;;  %3100 = vmatprep.subr.bf16.mxu1 %v3099_v7  ;;  %3094 = vmatpush3.bf16.msra.mxu0 %v3091_v3  ;;  %v3107_v14 = vpack.c.bf16 %v151_v13, %v150_v12  ;;  %v152_v16 = vld [vmem:[#allocation2 + $0x30] sm:$0xff]  ;;  %v153_v17 = vld [vmem:[#allocation2 + $0x38] sm:$0xff]  ;;  %v154_v19 = vld [vmem:[#allocation2 + $0x40] sm:$0xff] }
  0x98   :  { %3102 = vmatpush3.bf16.msra.mxu1 %v3099_v7  ;;  %3096 = vmatprep.subr.bf16.mxu0 %v3095_v8  ;;  %v3111_v18 = vpack.c.bf16 %v153_v17, %v152_v16  ;;  %v155_v20 = vld [vmem:[#allocation2 + $0x48] sm:$0xff]  ;;  %v156_v22 = vld [vmem:[#allocation2 + $0x50] sm:$0xff]  ;;  %v157_v23 = vld [vmem:[#allocation2 + $0x58] sm:$0xff] }
  0x99   :  { %3104 = vmatprep.subr.bf16.mxu1 %v3103_v11  ;;  %2771 = vmatprep.mubr.f32.mxu1 %v367_v15  ;;  %v3115_v21 = vpack.c.bf16 %v155_v20, %v154_v19  ;;  %v3119_v24 = vpack.c.bf16 %v157_v23, %v156_v22  ;;  %v158_v25 = vld [vmem:[#allocation2 + $0x60] sm:$0xff]  ;;  %v159_v26 = vld [vmem:[#allocation2 + $0x68] sm:$0xff]  ;;  %v160_v28 = vld [vmem:[#allocation2 + $0x70] sm:$0xff] }
  0x9a   :  { %v3123_v27 = vpack.c.bf16 %v159_v26, %v158_v25  ;;  %v161_v29 = vld [vmem:[#allocation2 + $0x78] sm:$0xff]  ;;  %v3957_v31 = vld [vmem:[#allocation5 + $0x8] sm:$0xff]  ;;  %v3959_v32 = vld [vmem:[#allocation5 + $0x10] sm:$0xff] }
  0x9b   :  { %3098 = vmatpush3.bf16.msra.mxu0 %v3095_v8  ;;  %v3127_v30 = vpack.c.bf16 %v161_v29, %v160_v28  ;;  %v3965_v33 = vld [vmem:[#allocation5 + $0x18] sm:$0xff]  ;;  %v3967_v34 = vld [vmem:[#allocation5 + $0x20] sm:$0xff]  ;;  %v3972_v35 = vld [vmem:[#allocation5 + $0x28] sm:$0xff] }
  0x9c   :  { %3106 = vmatpush3.bf16.msra.mxu1 %v3103_v11  ;;  %v3974_v36 = vld [vmem:[#allocation5 + $0x30] sm:$0xff]  ;;  %v3978_v37 = vld [vmem:[#allocation5 + $0x38] sm:$0xff]  ;;  %v3980_v38 = vld [vmem:[#allocation5 + $0x40] sm:$0xff] }
  0x9d   :  { %3108 = vmatprep.subr.bf16.mxu1 %v3107_v14  ;;  %v3984_v39 = vld [vmem:[#allocation5 + $0x48] sm:$0xff]  ;;  %v3986_v40 = vld [vmem:[#allocation5 + $0x50] sm:$0xff]  ;;  %v3990_v41 = vld [vmem:[#allocation5 + $0x58] sm:$0xff] }
  0x9e   :  { %2716 = vmatmul.mubr.msk.f32.vlgmr.msra.gmra.mrb[0].mxu0 %vm173_vm0, %v147_v4  ;;  %v3992_v42 = vld [vmem:[#allocation5 + $0x60] sm:$0xff]  ;;  %v3996_v43 = vld [vmem:[#allocation5 + $0x68] sm:$0xff]  ;;  %v3998_v44 = vld [vmem:[#allocation5 + $0x70] sm:$0xff] }
  0x9f   :  { %2718 = vmatprep.mubr.msk.f32.mxu0 %vm173_vm0, %v148_v9  ;;  %4624 = vst [vmem:[#allocation23_spill] sm:$0xff] %v3992_v42  ;;  %4625 = vst [vmem:[#allocation24_spill] sm:$0xff] %v3996_v43  ;;  %v4002_v45 = vld [vmem:[#allocation5 + $0x78] sm:$0xff]  ;;  %v4004_v46 = vld [vmem:[#allocation5 + $0x80] sm:$0xff] }
  0xa0   :  { %3110 = vmatpush3.bf16.msra.mxu1 %v3107_v14  ;;  %4626 = vst [vmem:[#allocation25_spill] sm:$0xff] %v3998_v44  ;;  %4627 = vst [vmem:[#allocation26_spill] sm:$0xff] %v4002_v45  ;;  %v4008_v47 = vld [vmem:[#allocation5 + $0x88] sm:$0xff]  ;;  %v4010_v48 = vld [vmem:[#allocation5 + $0x90] sm:$0xff] }
  0xa1   :  { %3112 = vmatprep.subr.bf16.mxu1 %v3111_v18  ;;  %4628 = vst [vmem:[#allocation27_spill] sm:$0xff] %v4004_v46  ;;  %4629 = vst [vmem:[#allocation28_spill] sm:$0xff] %v4008_v47  ;;  %v4014_v49 = vld [vmem:[#allocation5 + $0x98] sm:$0xff]  ;;  %v4016_v50 = vld [vmem:[#allocation5 + $0xa0] sm:$0xff] }
  0xa2   :  { %2719 = vmatmul.mubr.msk.f32.gmra.mrb[2].mxu0 %vm173_vm0, %v149_v10  ;;  %4630 = vst [vmem:[#allocation29_spill] sm:$0xff] %v4010_v48  ;;  %4631 = vst [vmem:[#allocation30_spill] sm:$0xff] %v4014_v49  ;;  %v4020_v51 = vld [vmem:[#allocation5 + $0xa8] sm:$0xff]  ;;  %v4022_v52 = vld [vmem:[#allocation5 + $0xb0] sm:$0xff] }
  0xa3   :  { %2721 = vmatprep.mubr.msk.f32.mxu0 %vm173_vm0, %v150_v12  ;;  %4632 = vst [vmem:[#allocation31_spill] sm:$0xff] %v4016_v50  ;;  %4633 = vst [vmem:[#allocation32_spill] sm:$0xff] %v4020_v51  ;;  %v4026_v53 = vld [vmem:[#allocation5 + $0xb8] sm:$0xff]  ;;  %v4028_v54 = vld [vmem:[#allocation5 + $0xc0] sm:$0xff] }
  0xa4   :  { %3114 = vmatpush3.bf16.msra.mxu1 %v3111_v18  ;;  %4634 = vst [vmem:[#allocation33_spill] sm:$0xff] %v4022_v52  ;;  %4635 = vst [vmem:[#allocation34_spill] sm:$0xff] %v4026_v53  ;;  %v4032_v55 = vld [vmem:[#allocation5 + $0xc8] sm:$0xff]  ;;  %v4034_v56 = vld [vmem:[#allocation5 + $0xd0] sm:$0xff] }
  0xa5   :  { %3116 = vmatprep.subr.bf16.mxu1 %v3115_v21  ;;  %4636 = vst [vmem:[#allocation35_spill] sm:$0xff] %v4028_v54  ;;  %4637 = vst [vmem:[#allocation36_spill] sm:$0xff] %v4032_v55  ;;  %v4038_v57 = vld [vmem:[#allocation5 + $0xd8] sm:$0xff]  ;;  %v4040_v58 = vld [vmem:[#allocation5 + $0xe0] sm:$0xff] }
  0xa6   :  { %2722 = vmatmul.mubr.msk.f32.gmra.mrb[4].mxu0 %vm173_vm0, %v151_v13  ;;  %4638 = vst [vmem:[#allocation37_spill] sm:$0xff] %v4034_v56  ;;  %4639 = vst [vmem:[#allocation38_spill] sm:$0xff] %v4038_v57  ;;  %v4044_v59 = vld [vmem:[#allocation5 + $0xe8] sm:$0xff]  ;;  %v4046_v60 = vld [vmem:[#allocation5 + $0xf0] sm:$0xff] }
  0xa7   :  { %2724 = vmatprep.mubr.msk.f32.mxu0 %vm173_vm0, %v152_v16  ;;  %4640 = vst [vmem:[#allocation39_spill] sm:$0xff] %v4040_v58  ;;  %4641 = vst [vmem:[#allocation40_spill] sm:$0xff] %v4044_v59  ;;  %v4050_v61 = vld [vmem:[#allocation5 + $0xf8] sm:$0xff]  ;;  %v4052_v62 = vld [vmem:[#allocation5 + $0x100] sm:$0xff] }
  0xa8   :  { %3118 = vmatpush3.bf16.msra.mxu1 %v3115_v21  ;;  %4642 = vst [vmem:[#allocation41_spill] sm:$0xff] %v4046_v60  ;;  %4643 = vst [vmem:[#allocation42_spill] sm:$0xff] %v4050_v61  ;;  %v4056_v63 = vld [vmem:[#allocation5 + $0x108] sm:$0xff]  ;;  %v4058_v0 = vld [vmem:[#allocation5 + $0x110] sm:$0xff] }
  0xa9   :  { %3120 = vmatprep.subr.bf16.mxu1 %v3119_v24  ;;  %4644 = vst [vmem:[#allocation43_spill] sm:$0xff] %v4052_v62  ;;  %4645 = vst [vmem:[#allocation44_spill] sm:$0xff] %v4056_v63  ;;  %v4062_v1 = vld [vmem:[#allocation5 + $0x118] sm:$0xff]  ;;  %v1199_v2 = vld [vmem:[%s4574_s6] sm:$0xff] }
  0xaa   :  { %2725 = vmatmul.mubr.msk.f32.gmra.mrb[6].mxu0 %vm173_vm0, %v153_v17  ;;  %4646 = vst [vmem:[#allocation45_spill] sm:$0xff] %v4058_v0  ;;  %4647 = vst [vmem:[#allocation46_spill] sm:$0xff] %v4062_v1  ;;  %v1200_v3 = vld [vmem:[%s4574_s6 + $0x8] sm:$0xff]  ;;  %v1201_v5 = vld [vmem:[%s4574_s6 + $0x10] sm:$0xff] }
  0xab   :  { %2727 = vmatprep.mubr.msk.f32.mxu0 %vm173_vm0, %v154_v19  ;;  %v3163_v4 = vpack.c.bf16 %v1200_v3, %v1199_v2  ;;  %v1202_v6 = vld [vmem:[%s4574_s6 + $0x18] sm:$0xff]  ;;  %v2408_v8 = vld [vmem:[#allocation11] ss:$0 sm:$0xff]  ;;  %s3735_s6 = smov 120   ;;  %vm4224_vm2 = vmpackc.low %vm1307_vm1, %vm1307_vm1 }
  0xac   :  { %3122 = vmatpush3.bf16.msra.mxu1 %v3119_v24  ;;  %v3167_v7 = vpack.c.bf16 %v1202_v6, %v1201_v5 }
  0xad   :  { %3124 = vmatprep.subr.bf16.mxu1 %v3123_v27 }
  0xae   :  { %2728 = vmatmul.mubr.msk.f32.gmra.mrb[8].mxu0 %vm173_vm0, %v155_v20 }
  0xaf   :  { %2730 = vmatprep.mubr.msk.f32.mxu0 %vm173_vm0, %v156_v22 }
  0xb0   :  { %3126 = vmatpush3.bf16.msra.mxu1 %v3123_v27 }
  0xb1   :  { %3128 = vmatprep.subr.bf16.mxu1 %v3127_v30 }
  0xb2   :  { %2731 = vmatmul.mubr.msk.f32.gmra.mrb[10].mxu0 %vm173_vm0, %v157_v23 }
  0xb3   :  { %2733 = vmatprep.mubr.msk.f32.mxu0 %vm173_vm0, %v158_v25 }
  0xb4   :  { %3130 = vmatpush3.bf16.msra.mxu1 %v3127_v30 }
  0xb5   :  { %3164 = vmatprep.subr.bf16.mxu1 %v3163_v4 }
  0xb6   :  { %2734 = vmatmul.mubr.msk.f32.gmra.mrb[12].mxu0 %vm173_vm0, %v159_v26 }
  0xb7   :  { %2772 = vmatmul.mubr.f32.vlgmr.msra.gmra.mrb[0].mxu1 %v3957_v31  ;;  %2736 = vmatprep.mubr.msk.f32.mxu0 %vm173_vm0, %v160_v28 }
  0xb8   :  { %2774 = vmatprep.mubr.f32.mxu1 %v3959_v32  ;;  %3166 = vmatpush3.bf16.msra.mxu1 %v3163_v4 }
  0xb9   :  { %3168 = vmatprep.subr.bf16.mxu1 %v3167_v7 }
  0xba   :  { %2737 = vmatmul.mubr.msk.f32.gmra.mrb[14].mxu0 %vm173_vm0, %v161_v29 }
  0xbb   :  { %2775 = vmatmul.mubr.f32.gmra.mrb[2].mxu1 %v3965_v33  ;;  %2857 = vmatprep.mubr.f32.mxu0 %v367_v15 }
  0xbc   :  { %2777 = vmatprep.mubr.f32.mxu1 %v3967_v34  ;;  %3170 = vmatpush3.bf16.msra.mxu1 %v3167_v7 }
  0xbf   :  { %2778 = vmatmul.mubr.f32.gmra.mrb[4].mxu1 %v3972_v35 }
  0xc0   :  { %2780 = vmatprep.mubr.f32.mxu1 %v3974_v36 }
  0xc3   :  { %2781 = vmatmul.mubr.f32.gmra.mrb[6].mxu1 %v3978_v37 }
  0xc4   :  { %2783 = vmatprep.mubr.f32.mxu1 %v3980_v38 }
  0xc7   :  { %2784 = vmatmul.mubr.f32.gmra.mrb[8].mxu1 %v3984_v39 }
  0xc8   :  { %2786 = vmatprep.mubr.f32.mxu1 %v3986_v40 }
  0xcb   :  { %2787 = vmatmul.mubr.f32.gmra.mrb[10].mxu1 %v3990_v41 }
  0xcc   :  { %2789 = vmatprep.mubr.f32.mxu1 %v3992_v42 }
  0xcf   :  { %2790 = vmatmul.mubr.f32.gmra.mrb[12].mxu1 %v3996_v43 }
  0xd0   :  { %2792 = vmatprep.mubr.f32.mxu1 %v3998_v44 }
  0xd3   :  { %2793 = vmatmul.mubr.f32.gmra.mrb[14].mxu1 %v4002_v45 }
  0xd4   :  { %2795 = vmatprep.mubr.f32.mxu1 %v4004_v46 }
  0xd7   :  { %2796 = vmatmul.mubr.f32.gmra.mrb[16].mxu1 %v4008_v47 }
  0xd8   :  { %2798 = vmatprep.mubr.f32.mxu1 %v4010_v48 }
  0xdb   :  { %2799 = vmatmul.mubr.f32.gmra.mrb[18].mxu1 %v4014_v49 }
  0xdc   :  { %2801 = vmatprep.mubr.f32.mxu1 %v4016_v50 }
  0xdf   :  { %2802 = vmatmul.mubr.f32.gmra.mrb[20].mxu1 %v4020_v51 }
  0xe0   :  { %2804 = vmatprep.mubr.f32.mxu1 %v4022_v52 }
  0xe3   :  { %2805 = vmatmul.mubr.f32.gmra.mrb[22].mxu1 %v4026_v53 }
  0xe4   :  { %2807 = vmatprep.mubr.f32.mxu1 %v4028_v54 }
  0xe7   :  { %2808 = vmatmul.mubr.f32.gmra.mrb[24].mxu1 %v4032_v55 }
  0xe8   :  { %2810 = vmatprep.mubr.f32.mxu1 %v4034_v56 }
  0xeb   :  { %2811 = vmatmul.mubr.f32.gmra.mrb[26].mxu1 %v4038_v57 }
  0xec   :  { %2813 = vmatprep.mubr.f32.mxu1 %v4040_v58 }
  0xef   :  { %2814 = vmatmul.mubr.f32.gmra.mrb[28].mxu1 %v4044_v59 }
  0xf0   :  { %2816 = vmatprep.mubr.f32.mxu1 %v4046_v60 }
  0xf3   :  { %2817 = vmatmul.mubr.f32.gmra.mrb[30].mxu1 %v4050_v61 }
  0xf4   :  { %2819 = vmatprep.mubr.f32.mxu1 %v4052_v62 }
  0xf7   :  { %2820 = vmatmul.mubr.f32.gmra.mrb[32].mxu1 %v4056_v63 }
  0xf8   :  { %2822 = vmatprep.mubr.f32.mxu1 %v4058_v0 }
  0xfb   :  { %2823 = vmatmul.mubr.f32.gmra.mrb[34].mxu1 %v4062_v1 }
 0x171   :  { %v2717_v9 = vpop.f32.mrb[0].mxu0 }
 0x172   :  { %v294_v10 = vadd.f32 %v2717_v9, %v2408_v8  ;;  %v288_v11 = vpop.f32.mrb[1].mxu0 }
 0x173   :  { %v289_v12 = vadd.f32 %v2408_v8, %v288_v11 }
 0x175   :  { %v2720_v13 = vpop.f32.mrb[2].mxu0  ;;  %v4077_v14 = vpack.i.bf16 %v294_v10, %v289_v12 }
 0x176   :  { %v304_v15 = vadd.f32 %v2720_v13, %v2408_v8  ;;  %v298_v16 = vpop.f32.mrb[3].mxu0 }
 0x177   :  { %4648 = vst [vmem:[#allocation47_spill] sm:$0xff] %v4077_v14  ;;  %v299_v17 = vadd.f32 %v2408_v8, %v298_v16  ;;  %3355 = vrot.lane.b32.xlu0 %v4077_v14, %s3734_s28 }
 0x179   :  { %v2723_v18 = vpop.f32.mrb[4].mxu0  ;;  %v4081_v19 = vpack.i.bf16 %v304_v15, %v299_v17 }
 0x17a   :  { %v314_v20 = vadd.f32 %v2723_v18, %v2408_v8  ;;  %v308_v21 = vpop.f32.mrb[5].mxu0 }
 0x17b   :  { %4649 = vst [vmem:[#allocation48_spill] sm:$0xff] %v4081_v19  ;;  %v309_v22 = vadd.f32 %v2408_v8, %v308_v21  ;;  %3360 = vrot.lane.b32.xlu0 %v4081_v19, %s3734_s28 }
 0x17d   :  { %v2726_v23 = vpop.f32.mrb[6].mxu0  ;;  %v4085_v24 = vpack.i.bf16 %v314_v20, %v309_v22  ;;  %v4141_v62 = vpack.c.bf16 %v314_v20, %v309_v22 }
 0x17e   :  { %v324_v25 = vadd.f32 %v2726_v23, %v2408_v8  ;;  %v318_v26 = vpop.f32.mrb[7].mxu0 }
 0x17f   :  { %4650 = vst [vmem:[#allocation49_spill] sm:$0xff] %v4085_v24  ;;  %v319_v27 = vadd.f32 %v2408_v8, %v318_v26  ;;  %3365 = vrot.lane.b32.xlu1 %v4085_v24, %s3734_s28 }
 0x181   :  { %v2729_v28 = vpop.f32.mrb[8].mxu0  ;;  %v4089_v29 = vpack.i.bf16 %v324_v25, %v319_v27  ;;  %v4153_v20 = vpack.c.bf16 %v324_v25, %v319_v27 }
 0x182   :  { %v4091_v30 = vadd.f32 %v2729_v28, %v2408_v8  ;;  %v328_v2 = vpop.f32.mrb[9].mxu0  ;;  %v4117_v28 = vpack.c.bf16 %v294_v10, %v289_v12 }
 0x183   :  { %4651 = vst [vmem:[#allocation50_spill] sm:$0xff] %v4089_v29  ;;  %v4093_v3 = vadd.f32 %v2408_v8, %v328_v2  ;;  %3370 = vrot.lane.b32.xlu1 %v4089_v29, %s3734_s28  ;;  %4656 = vst [vmem:[#allocation55_spill] sm:$0xff] %v4153_v20 }
 0x185   :  { %v2732_v4 = vpop.f32.mrb[10].mxu0  ;;  %v4099_v5 = vpack.i.bf16 %v4091_v30, %v4093_v3 }
 0x186   :  { %v4101_v6 = vadd.f32 %v2732_v4, %v2408_v8  ;;  %v338_v7 = vpop.f32.mrb[11].mxu0 }
 0x187   :  { %4652 = vst [vmem:[#allocation51_spill] sm:$0xff] %v4099_v5  ;;  %v4103_v9 = vadd.f32 %v2408_v8, %v338_v7  ;;  %3375 = vrot.lane.b32.xlu0 %v4099_v5, %s3734_s28 }
 0x189   :  { %v2735_v11 = vpop.f32.mrb[12].mxu0  ;;  %v4109_v13 = vpack.i.bf16 %v4101_v6, %v4103_v9 }
 0x18a   :  { %v4111_v16 = vadd.f32 %v2735_v11, %v2408_v8  ;;  %v2773_v18 = vpop.f32.mrb[0].mxu1  ;;  %v348_v21 = vpop.f32.mrb[13].mxu0 }
 0x18b   :  { %4653 = vst [vmem:[#allocation52_spill] sm:$0xff] %v4109_v13  ;;  %v4113_v23 = vadd.f32 %v2408_v8, %v348_v21  ;;  %v469_v26 = vpop.f32.mrb[1].mxu1  ;;  %3380 = vrot.lane.b32.xlu1 %v4109_v13, %s3734_s28  ;;  %v4135_v13 = vpack.c.bf16 %v304_v15, %v299_v17 }
 0x18d   :  { %v2738_v2 = vpop.f32.mrb[14].mxu0  ;;  %v4121_v4 = vpack.i.bf16 %v4111_v16, %v4113_v23 }
 0x18e   :  { %v4123_v7 = vadd.f32 %v2738_v2, %v2408_v8  ;;  %v2776_v5 = vpop.f32.mrb[2].mxu1  ;;  %v358_v11 = vpop.f32.mrb[15].mxu0 }
 0x18f   :  { %4654 = vst [vmem:[#allocation53_spill] sm:$0xff] %v4121_v4  ;;  %v4125_v1 = vadd.f32 %v2408_v8, %v358_v11  ;;  %v479_v0 = vpop.f32.mrb[3].mxu1  ;;  %3385 = vrot.lane.b32.xlu0 %v4121_v4, %s3734_s28  ;;  %v961_v11 = vlaneseq }
 0x191   :  { %v4131_v21 = vpack.i.bf16 %v4123_v7, %v4125_v1  ;;  %v4143_v61 = vshrl.u32 %v961_v11, 7 }
 0x192   :  { %v2779_v10 = vpop.f32.mrb[4].mxu1 }
 0x193   :  { %4655 = vst [vmem:[#allocation54_spill] sm:$0xff] %v4131_v21  ;;  %v489_v12 = vpop.f32.mrb[5].mxu1  ;;  %3390 = vrot.lane.b32.xlu1 %v4131_v21, %s3734_s28  ;;  %3395 = vrot.lane.b32.xlu0 %v4077_v14, %s3735_s6  ;;  %v4605_v17 = vsub.s32 0, %v4143_v61  ;;  %v4150_v21 = vld [vmem:[#allocation7] sm:$0xff]  ;;  %v4609_v14 = vsub.s32 1, %v4143_v61  ;;  %v4613_v11 = vsub.s32 2, %v4143_v61 }
 0x194   :  { %v4657_v52 = vsub.s32 5, %v4143_v61 }
 0x195   :  { %v964_v22 = vrot.slane %v4150_v21, %v4605_v17  ;;  %v988_v56 = vrot.slane %v4150_v21, %v4609_v14  ;;  %v1012_v27 = vrot.slane %v4150_v21, %v4613_v11 }
 0x196   :  { %v2782_v2 = vpop.f32.mrb[6].mxu1  ;;  %v1084_v14 = vrot.slane %v4150_v21, %v4657_v52  ;;  %v4180_v52 = vpack.c.bf16 %v4091_v30, %v4093_v3  ;;  %v4184_v30 = vpack.c.bf16 %v4101_v6, %v4103_v9 }
 0x197   :  { %v499_v8 = vpop.f32.mrb[7].mxu1  ;;  %3400 = vrot.lane.b32.xlu1 %v4081_v19, %s3735_s6  ;;  %3405 = vrot.lane.b32.xlu0 %v4085_v24, %s3735_s6  ;;  %v4617_v24 = vsub.s32 3, %v4143_v61  ;;  %v966_v25 = vmul.f32 %v2773_v18, %v964_v22  ;;  %v965_v53 = vmul.f32 %v964_v22, %v469_v26  ;;  %v968_v51 = vmul.f32 %v2776_v5, %v964_v22 }
 0x198   :  { %v967_v50 = vmul.f32 %v964_v22, %v479_v0  ;;  %v990_v49 = vmul.f32 %v2779_v10, %v988_v56  ;;  %v989_v47 = vmul.f32 %v988_v56, %v489_v12  ;;  %v992_v46 = vmul.f32 %v2782_v2, %v988_v56 }
 0x199   :  { %v1036_v17 = vrot.slane %v4150_v21, %v4617_v24  ;;  %v991_v24 = vmul.f32 %v988_v56, %v499_v8 }
 0x19a   :  { %v2785_v4 = vpop.f32.mrb[8].mxu1 }
 0x19b   :  { %v509_v63 = vpop.f32.mrb[9].mxu1  ;;  %3410 = vrot.lane.b32.xlu1 %v4089_v29, %s3735_s6  ;;  %v4621_v29 = vsub.s32 4, %v4143_v61  ;;  %v1014_v44 = vmul.f32 %v2785_v4, %v1012_v27 }
 0x19c   :  { %v1013_v43 = vmul.f32 %v1012_v27, %v509_v63 }
 0x19d   :  { %v1060_v54 = vrot.slane %v4150_v21, %v4621_v29 }
 0x19e   :  { %v2788_v60 = vpop.f32.mrb[10].mxu1 }
 0x19f   :  { %v519_v15 = vpop.f32.mrb[11].mxu1  ;;  %v1016_v29 = vmul.f32 %v2788_v60, %v1012_v27 }
 0x1a0   :  { %v1015_v18 = vmul.f32 %v1012_v27, %v519_v15  ;;  %v4658_v27 = vsub.s32 6, %v4143_v61 }
 0x1a2   :  { %v2791_v19 = vpop.f32.mrb[12].mxu1 }
 0x1a3   :  { %v529_v59 = vpop.f32.mrb[13].mxu1  ;;  %v1038_v5 = vmul.f32 %v2791_v19, %v1036_v17 }
 0x1a6   :  { %v2794_v58 = vpop.f32.mrb[14].mxu1 }
 0x1a7   :  { %v539_v55 = vpop.f32.mrb[15].mxu1  ;;  %v1040_v12 = vmul.f32 %v2794_v58, %v1036_v17 }
 0x1a8   :  { %v1039_v8 = vmul.f32 %v1036_v17, %v539_v55  ;;  %v1108_v55 = vrot.slane %v4150_v21, %v4658_v27 }
 0x1aa   :  { %v2797_v57 = vpop.f32.mrb[16].mxu1 }
 0x1ab   :  { %v970_v11 = vadd.f32 %v2797_v57, %v966_v25  ;;  %v549_v48 = vpop.f32.mrb[17].mxu1  ;;  %v1037_v25 = vmul.f32 %v1036_v17, %v529_v59  ;;  %v1062_v4 = vmul.f32 %v2797_v57, %v1060_v54 }
 0x1ac   :  { %v969_v45 = vadd.f32 %v965_v53, %v549_v48  ;;  %v1061_v63 = vmul.f32 %v1060_v54, %v549_v48 }
 0x1ad   :  { %v994_v26 = vadd.f32 %v990_v49, %v970_v11  ;;  %v4188_v11 = vpack.c.bf16 %v4111_v16, %v4113_v23  ;;  %v1131_v16 = vsub.s32 7, %v4143_v61 }
 0x1ae   :  { %v993_v20 = vadd.f32 %v989_v47, %v969_v45  ;;  %v2800_v42 = vpop.f32.mrb[18].mxu1 }
 0x1af   :  { %v1018_v0 = vadd.f32 %v1014_v44, %v994_v26  ;;  %v972_v10 = vadd.f32 %v2800_v42, %v968_v51  ;;  %v559_v22 = vpop.f32.mrb[19].mxu1  ;;  %v1064_v15 = vmul.f32 %v2800_v42, %v1060_v54 }
 0x1b0   :  { %v1017_v2 = vadd.f32 %v1013_v43, %v993_v20  ;;  %v971_v56 = vadd.f32 %v967_v50, %v559_v22  ;;  %v1063_v57 = vmul.f32 %v1060_v54, %v559_v22 }
 0x1b1   :  { %v1042_v53 = vadd.f32 %v1038_v5, %v1018_v0  ;;  %v996_v60 = vadd.f32 %v992_v46, %v972_v10  ;;  %v4195_v5 = vpack.c.bf16 %v4123_v7, %v4125_v1 }
 0x1b2   :  { %v1041_v49 = vadd.f32 %v1037_v25, %v1017_v2  ;;  %v995_v45 = vadd.f32 %v991_v24, %v971_v56  ;;  %v2803_v47 = vpop.f32.mrb[20].mxu1 }
 0x1b3   :  { %v1066_v3 = vadd.f32 %v1062_v4, %v1042_v53  ;;  %v1020_v19 = vadd.f32 %v1016_v29, %v996_v60  ;;  %v1086_v44 = vmul.f32 %v2803_v47, %v1084_v14  ;;  %v569_v51 = vpop.f32.mrb[21].mxu1 }
 0x1b4   :  { %v1065_v59 = vadd.f32 %v1061_v63, %v1041_v49  ;;  %v1019_v58 = vadd.f32 %v1015_v18, %v995_v45  ;;  %v1085_v43 = vmul.f32 %v1084_v14, %v569_v51 }
 0x1b5   :  { %v1044_v50 = vadd.f32 %v1040_v12, %v1020_v19  ;;  %v1090_v48 = vadd.f32 %v1086_v44, %v1066_v3 }
 0x1b6   :  { %v1043_v46 = vadd.f32 %v1039_v8, %v1019_v58  ;;  %v1089_v20 = vadd.f32 %v1085_v43, %v1065_v59  ;;  %v2806_v24 = vpop.f32.mrb[22].mxu1  ;;  %v2425_v8 = vld [vmem:[#allocation7 + $0x8] ss:$0 sm:$0xff] }
 0x1b7   :  { %v1068_v6 = vadd.f32 %v1064_v15, %v1044_v50  ;;  %v1088_v9 = vmul.f32 %v2806_v24, %v1084_v14  ;;  %v579_v29 = vpop.f32.mrb[23].mxu1 }
 0x1b8   :  { %v1067_v17 = vadd.f32 %v1063_v57, %v1043_v46  ;;  %v1087_v18 = vmul.f32 %v1084_v14, %v579_v29  ;;  %v1132_v14 = vrot.slane %v4150_v21, %v1131_v16 }
 0x1b9   :  { %v1092_v26 = vadd.f32 %v1088_v9, %v1068_v6 }
 0x1ba   :  { %v1091_v42 = vadd.f32 %v1087_v18, %v1067_v17  ;;  %v2809_v54 = vpop.f32.mrb[24].mxu1 }
 0x1bb   :  { %v1110_v0 = vmul.f32 %v2809_v54, %v1108_v55  ;;  %v589_v10 = vpop.f32.mrb[25].mxu1 }
 0x1bc   :  { %v1109_v23 = vmul.f32 %v1108_v55, %v589_v10 }
 0x1bd   :  { %v1114_v22 = vadd.f32 %v1110_v0, %v1090_v48  ;;  %v2427_v48 = vld [vmem:[%s4571_s3] ss:$0 sm:$0xff]  ;;  %s3736_s3 = smov 96  }
 0x1be   :  { %v1113_v25 = vadd.f32 %v1109_v23, %v1089_v20  ;;  %v2812_v12 = vpop.f32.mrb[26].mxu1 }
 0x1bf   :  { %v1112_v2 = vmul.f32 %v2812_v12, %v1108_v55  ;;  %v599_v56 = vpop.f32.mrb[27].mxu1 }
 0x1c0   :  { %v1111_v53 = vmul.f32 %v1108_v55, %v599_v56 }
 0x1c1   :  { %v1116_v4 = vadd.f32 %v1112_v2, %v1092_v26 }
 0x1c2   :  { %v1115_v63 = vadd.f32 %v1111_v53, %v1091_v42  ;;  %v2815_v60 = vpop.f32.mrb[28].mxu1 }
 0x1c3   :  { %v1134_v1 = vmul.f32 %v2815_v60, %v1132_v14  ;;  %v609_v7 = vpop.f32.mrb[29].mxu1 }
 0x1c4   :  { %v1133_v49 = vmul.f32 %v1132_v14, %v609_v7 }
 0x1c5   :  { %v1138_v45 = vadd.f32 %v1134_v1, %v1114_v22 }
 0x1c6   :  { %v1137_v47 = vadd.f32 %v1133_v49, %v1113_v25  ;;  %v2818_v3 = vpop.f32.mrb[30].mxu1 }
 0x1c7   :  { %v1136_v19 = vmul.f32 %v2818_v3, %v1132_v14  ;;  %v619_v44 = vpop.f32.mrb[31].mxu1 }
 0x1c8   :  { %v1135_v51 = vmul.f32 %v1132_v14, %v619_v44 }
 0x1c9   :  { %v1140_v59 = vadd.f32 %v1136_v19, %v1116_v4 }
 0x1ca   :  { %v1139_v58 = vadd.f32 %v1135_v51, %v1115_v63  ;;  %v2821_v43 = vpop.f32.mrb[32].mxu1 }
 0x1cb   :  { %v1158_v50 = vmul.f32 %v2821_v43, %v2425_v8  ;;  %v629_v15 = vpop.f32.mrb[33].mxu1 }
 0x1cc   :  { %v1157_v21 = vmul.f32 %v2425_v8, %v629_v15 }
 0x1cd   :  { %v1162_v57 = vadd.f32 %v1158_v50, %v1138_v45 }
 0x1ce   :  { %v1161_v46 = vadd.f32 %v1157_v21, %v1137_v47  ;;  %v2824_v20 = vpop.f32.mrb[34].mxu1 }
 0x1cf   :  { %v1160_v24 = vmul.f32 %v2824_v20, %v2425_v8  ;;  %v639_v6 = vpop.f32.mrb[35].mxu1  ;;  %v1185_v27 = vadd.f32 %v2427_v48, %v1162_v57  ;;  %v4672_v20 = vld [vmem:[#allocation33_spill] sm:$0xff] }
 0x1d0   :  { %v1184_v9 = vadd.f32 %v2427_v48, %v1161_v46  ;;  %v1159_v29 = vmul.f32 %v2425_v8, %v639_v6  ;;  %v4671_v46 = vld [vmem:[#allocation32_spill] sm:$0xff]  ;;  %v4674_v6 = vld [vmem:[#allocation35_spill] sm:$0xff] }
 0x1d1   :  { %v1164_v55 = vadd.f32 %v1160_v24, %v1140_v59  ;;  %v4673_v24 = vld [vmem:[#allocation34_spill] sm:$0xff] }
 0x1d2   :  { %v1163_v17 = vadd.f32 %v1159_v29, %v1139_v58  ;;  %2919 = vmatprep.mubr.msk.f32.mxu1 %vm173_vm0, %v1184_v9  ;;  %v4675_v9 = vld [vmem:[#allocation36_spill] sm:$0xff]  ;;  %v4676_v29 = vld [vmem:[#allocation37_spill] sm:$0xff] }
 0x1d3   :  { %2920 = vmatmul.mubr.msk.f32.vlgmr.msra.gmra.mrb[36].mxu1 %vm173_vm0, %v1185_v27  ;;  %v1187_v26 = vadd.f32 %v2427_v48, %v1164_v55  ;;  %v4677_v27 = vld [vmem:[#allocation38_spill] sm:$0xff]  ;;  %v4678_v55 = vld [vmem:[#allocation39_spill] sm:$0xff] }
 0x1d4   :  { %v1186_v18 = vadd.f32 %v2427_v48, %v1163_v17  ;;  %v4679_v17 = vld [vmem:[#allocation40_spill] sm:$0xff] }
 0x1d6   :  { %2922 = vmatprep.mubr.msk.f32.mxu1 %vm173_vm0, %v1186_v18  ;;  %v4680_v18 = vld [vmem:[#allocation41_spill] sm:$0xff] }
 0x1d7   :  { %2923 = vmatmul.mubr.msk.f32.gmra.mrb[38].mxu1 %vm173_vm0, %v1187_v26  ;;  %v4681_v26 = vld [vmem:[#allocation42_spill] sm:$0xff] }
 0x1e9   :  { %v3356_v42 = vpop.permute.xlu0 %3355 }
 0x1ea   :  { %v3358_v54 = vunpack.i.h.bf16 %v3356_v42  ;;  %v3357_v0 = vunpack.i.l.bf16 %v3356_v42  ;;  %v4682_v42 = vld [vmem:[#allocation43_spill] sm:$0xff] }
 0x1ec   :  { %v3131_v10 = vpack.c.bf16 %v3358_v54, %v3357_v0  ;;  %v4683_v54 = vld [vmem:[#allocation44_spill] sm:$0xff]  ;;  %v4684_v0 = vld [vmem:[#allocation45_spill] sm:$0xff] }
 0x1ed   :  { %v3361_v23 = vpop.permute.xlu0 %3360 }
 0x1ee   :  { %v3363_v22 = vunpack.i.h.bf16 %v3361_v23  ;;  %v3362_v25 = vunpack.i.l.bf16 %v3361_v23  ;;  %3132 = vmatprep.subr.bf16.mxu0 %v3131_v10  ;;  %3196 = vmatprep.subr.bf16.mxu1 %v3131_v10 }
 0x1ef   :  { %3134 = vmatpush3.bf16.msra.mxu0 %v3131_v10  ;;  %3198 = vmatpush3.bf16.msra.mxu1 %v3131_v10  ;;  %v4685_v10 = vld [vmem:[#allocation46_spill] sm:$0xff] }
 0x1f0   :  { %v3135_v12 = vpack.c.bf16 %v3363_v22, %v3362_v25  ;;  %v2429_v22 = vld [vmem:[#allocation10] ss:$0 sm:$0xff] }
 0x1f1   :  { %v3366_v2 = vpop.permute.xlu1 %3365 }
 0x1f2   :  { %v3368_v56 = vunpack.i.h.bf16 %v3366_v2  ;;  %v3367_v14 = vunpack.i.l.bf16 %v3366_v2  ;;  %3136 = vmatprep.subr.bf16.mxu0 %v3135_v12  ;;  %3200 = vmatprep.subr.bf16.mxu1 %v3135_v12 }
 0x1f3   :  { %3138 = vmatpush3.bf16.msra.mxu0 %v3135_v12  ;;  %3202 = vmatpush3.bf16.msra.mxu1 %v3135_v12 }
 0x1f4   :  { %v3139_v53 = vpack.c.bf16 %v3368_v56, %v3367_v14 }
 0x1f5   :  { %v3371_v4 = vpop.permute.xlu1 %3370 }
 0x1f6   :  { %v3373_v63 = vunpack.i.h.bf16 %v3371_v4  ;;  %v3372_v60 = vunpack.i.l.bf16 %v3371_v4  ;;  %3140 = vmatprep.subr.bf16.mxu0 %v3139_v53  ;;  %3204 = vmatprep.subr.bf16.mxu1 %v3139_v53 }
 0x1f7   :  { %3142 = vmatpush3.bf16.msra.mxu0 %v3139_v53  ;;  %3206 = vmatpush3.bf16.msra.mxu1 %v3139_v53 }
 0x1f8   :  { %v3143_v1 = vpack.c.bf16 %v3373_v63, %v3372_v60 }
 0x1f9   :  { %v3376_v7 = vpop.permute.xlu0 %3375 }
 0x1fa   :  { %v3378_v49 = vunpack.i.h.bf16 %v3376_v7  ;;  %v3377_v45 = vunpack.i.l.bf16 %v3376_v7  ;;  %3144 = vmatprep.subr.bf16.mxu0 %v3143_v1  ;;  %3208 = vmatprep.subr.bf16.mxu1 %v3143_v1 }
 0x1fb   :  { %3146 = vmatpush3.bf16.msra.mxu0 %v3143_v1  ;;  %3210 = vmatpush3.bf16.msra.mxu1 %v3143_v1 }
 0x1fc   :  { %v4208_v47 = vpack.c.bf16 %v3378_v49, %v3377_v45  ;;  %v4686_v45 = vld [vmem:[#allocation47_spill] sm:$0xff] }
 0x1fd   :  { %v3381_v3 = vpop.permute.xlu1 %3380 }
 0x1fe   :  { %v3383_v19 = vunpack.i.h.bf16 %v3381_v3  ;;  %v3382_v44 = vunpack.i.l.bf16 %v3381_v3  ;;  %3148 = vmatprep.subr.bf16.mxu0 %v4208_v47 }
 0x1ff   :  { %3150 = vmatpush3.bf16.msra.mxu0 %v4208_v47 }
 0x200   :  { %v4212_v51 = vpack.c.bf16 %v3383_v19, %v3382_v44 }
 0x201   :  { %v3386_v8 = vpop.permute.xlu0 %3385 }
 0x202   :  { %v3388_v59 = vunpack.i.h.bf16 %v3386_v8  ;;  %v3387_v58 = vunpack.i.l.bf16 %v3386_v8  ;;  %3152 = vmatprep.subr.bf16.mxu0 %v4212_v51 }
 0x203   :  { %3154 = vmatpush3.bf16.msra.mxu0 %v4212_v51 }
 0x204   :  { %v4216_v43 = vpack.c.bf16 %v3388_v59, %v3387_v58 }
 0x205   :  { %v3391_v50 = vpop.permute.xlu1 %3390 }
 0x206   :  { %v3393_v15 = vunpack.i.h.bf16 %v3391_v50  ;;  %v3392_v21 = vunpack.i.l.bf16 %v3391_v50  ;;  %3156 = vmatprep.subr.bf16.mxu0 %v4216_v43 }
 0x207   :  { %3158 = vmatpush3.bf16.msra.mxu0 %v4216_v43 }
 0x208   :  { %v4220_v57 = vpack.c.bf16 %v3393_v15, %v3392_v21  ;;  %v4319_v21 = vld [vmem:[%s4572_s4] sm:$0xff] }
 0x209   :  { %v3401_v23 = vpop.permute.xlu1 %3400 }
 0x20a   :  { %3160 = vmatprep.subr.bf16.mxu0 %v4220_v57  ;;  %v3403_v12 = vunpack.i.h.bf16 %v3401_v23  ;;  %v3402_v2 = vunpack.i.l.bf16 %v3401_v23 }
 0x20b   :  { %3162 = vmatpush3.bf16.msra.mxu0 %v4220_v57 }
 0x20c   :  { %3173 = vmatprep.subr.msk.bf16.mxu0 %vm4224_vm2, %v4117_v28  ;;  %v3217_v63 = vpack.c.bf16 %v3403_v12, %v3402_v2 }
 0x20d   :  { %v3411_v8 = vpop.permute.xlu1 %3410 }
 0x20e   :  { %2858 = vmatmul.mubr.f32.vlgmr.msra.gmra.mrb[16].mxu0 %v3957_v31  ;;  %v3396_v31 = vpop.permute.xlu0 %3395  ;;  %v3413_v59 = vunpack.i.h.bf16 %v3411_v8  ;;  %v3412_v58 = vunpack.i.l.bf16 %v3411_v8 }
 0x20f   :  { %2860 = vmatprep.mubr.f32.mxu0 %v3959_v32  ;;  %v4661_v32 = vld [vmem:[#allocation23_spill] sm:$0xff] }
 0x210   :  { %v3229_v50 = vpack.c.bf16 %v3413_v59, %v3412_v58 }
 0x212   :  { %2861 = vmatmul.mubr.f32.gmra.mrb[18].mxu0 %v3965_v33  ;;  %v4662_v33 = vld [vmem:[#allocation55_spill] sm:$0xff]  ;;  %v3406_v7 = vpop.permute.xlu0 %3405 }
 0x213   :  { %2863 = vmatprep.mubr.f32.mxu0 %v3967_v34  ;;  %v3398_v34 = vunpack.i.h.bf16 %v3396_v31  ;;  %v3408_v3 = vunpack.i.h.bf16 %v3406_v7  ;;  %v3407_v19 = vunpack.i.l.bf16 %v3406_v7 }
 0x214   :  { %3176 = vmatpush3.bf16.xpose.msk.msra.mxu0 %vm4224_vm2, %v4117_v28  ;;  %v4670_v28 = vld [vmem:[#allocation31_spill] sm:$0xff] }
 0x215   :  { %3179 = vmatprep.subr.msk.bf16.mxu0 %vm4224_vm2, %v4135_v13  ;;  %v3223_v44 = vpack.c.bf16 %v3408_v3, %v3407_v19 }
 0x216   :  { %2864 = vmatmul.mubr.f32.gmra.mrb[20].mxu0 %v3972_v35  ;;  %v3397_v35 = vunpack.i.l.bf16 %v3396_v31 }
 0x217   :  { %2866 = vmatprep.mubr.f32.mxu0 %v3974_v36  ;;  %v4663_v36 = vld [vmem:[#allocation24_spill] sm:$0xff] }
 0x21a   :  { %2867 = vmatmul.mubr.f32.gmra.mrb[22].mxu0 %v3978_v37  ;;  %v4664_v37 = vld [vmem:[#allocation25_spill] sm:$0xff] }
 0x21b   :  { %2869 = vmatprep.mubr.f32.mxu0 %v3980_v38  ;;  %v3211_v38 = vpack.c.bf16 %v3398_v34, %v3397_v35 }
 0x21c   :  { %3182 = vmatpush3.bf16.xpose.msk.msra.mxu0 %vm4224_vm2, %v4135_v13  ;;  %v4669_v13 = vld [vmem:[#allocation30_spill] sm:$0xff] }
 0x21d   :  { %3185 = vmatprep.subr.msk.bf16.mxu0 %vm4224_vm2, %v4141_v62 }
 0x21e   :  { %2870 = vmatmul.mubr.f32.gmra.mrb[24].mxu0 %v3984_v39  ;;  %v4665_v39 = vld [vmem:[#allocation26_spill] sm:$0xff] }
 0x21f   :  { %2872 = vmatprep.mubr.f32.mxu0 %v3986_v40  ;;  %v4666_v40 = vld [vmem:[#allocation27_spill] sm:$0xff] }
 0x222   :  { %2873 = vmatmul.mubr.f32.gmra.mrb[26].mxu0 %v3990_v41  ;;  %v4667_v41 = vld [vmem:[#allocation28_spill] sm:$0xff] }
 0x223   :  { %2875 = vmatprep.mubr.f32.mxu0 %v4661_v32  ;;  %v4687_v32 = vsub.s32 0, %v4143_v61 }
 0x224   :  { %3188 = vmatpush3.bf16.xpose.msk.msra.mxu0 %vm4224_vm2, %v4141_v62  ;;  %v4668_v62 = vld [vmem:[#allocation29_spill] sm:$0xff] }
 0x225   :  { %3191 = vmatprep.subr.msk.bf16.mxu0 %vm4224_vm2, %v4662_v33 }
 0x226   :  { %2876 = vmatmul.mubr.f32.gmra.mrb[28].mxu0 %v4663_v36 }
 0x227   :  { %2878 = vmatprep.mubr.f32.mxu0 %v4664_v37  ;;  %v4688_v37 = vsub.s32 1, %v4143_v61 }
 0x22a   :  { %2879 = vmatmul.mubr.f32.gmra.mrb[30].mxu0 %v4665_v39 }
 0x22b   :  { %2881 = vmatprep.mubr.f32.mxu0 %v4666_v40 }
 0x22c   :  { %3194 = vmatpush3.bf16.xpose.msk.msra.mxu0 %vm4224_vm2, %v4662_v33  ;;  %v976_v33 = vrot.slane %v4319_v21, %v4687_v32 }
 0x22d   :  { %3213 = vmatprep.subr.msk.bf16.mxu0 %vm4224_vm2, %v3211_v38 }
 0x22e   :  { %2882 = vmatmul.mubr.f32.gmra.mrb[32].mxu0 %v4667_v41 }
 0x22f   :  { %2884 = vmatprep.mubr.f32.mxu0 %v4668_v62 }
 0x232   :  { %2885 = vmatmul.mubr.f32.gmra.mrb[34].mxu0 %v4669_v13 }
 0x233   :  { %2887 = vmatprep.mubr.f32.mxu0 %v4670_v28 }
 0x236   :  { %2888 = vmatmul.mubr.f32.gmra.mrb[36].mxu0 %v4671_v46 }
 0x237   :  { %2890 = vmatprep.mubr.f32.mxu0 %v4672_v20 }
 0x23a   :  { %2891 = vmatmul.mubr.f32.gmra.mrb[38].mxu0 %v4673_v24 }
 0x23b   :  { %2893 = vmatprep.mubr.f32.mxu0 %v4674_v6 }
 0x23e   :  { %2894 = vmatmul.mubr.f32.gmra.mrb[40].mxu0 %v4675_v9 }
 0x23f   :  { %2896 = vmatprep.mubr.f32.mxu0 %v4676_v29 }
 0x242   :  { %2897 = vmatmul.mubr.f32.gmra.mrb[42].mxu0 %v4677_v27  ;;  %v4689_v27 = vsub.s32 2, %v4143_v61 }
 0x243   :  { %2899 = vmatprep.mubr.f32.mxu0 %v4678_v55 }
 0x244   :  { %v1024_v55 = vrot.slane %v4319_v21, %v4689_v27 }
 0x246   :  { %2900 = vmatmul.mubr.f32.gmra.mrb[44].mxu0 %v4679_v17 }
 0x247   :  { %2902 = vmatprep.mubr.f32.mxu0 %v4680_v18 }
 0x24a   :  { %2903 = vmatmul.mubr.f32.gmra.mrb[46].mxu0 %v4681_v26 }
 0x24b   :  { %2905 = vmatprep.mubr.f32.mxu0 %v4682_v42 }
 0x24e   :  { %2906 = vmatmul.mubr.f32.gmra.mrb[48].mxu0 %v4683_v54 }
 0x24f   :  { %2908 = vmatprep.mubr.f32.mxu0 %v4684_v0 }
 0x252   :  { %2909 = vmatmul.mubr.f32.gmra.mrb[50].mxu0 %v4685_v10 }
 0x2a6   :  { %v2921_v25 = vpop.f32.mrb[36].mxu1 }
 0x2a7   :  { %v1294_v56 = vadd.f32 %v2921_v25, %v2429_v22  ;;  %v1288_v14 = vpop.f32.mrb[37].mxu1 }
 0x2a8   :  { %v1289_v53 = vadd.f32 %v2429_v22, %v1288_v14 }
 0x2a9   :  { %1517 = vrot.lane.b32.xlu1 %v1294_v56, %s3735_s6 }
 0x2aa   :  { %v2924_v4 = vpop.f32.mrb[38].mxu1  ;;  %1515 = vrot.lane.b32.xlu0 %v1289_v53, %s3735_s6  ;;  %2941 = vmatprep.mubr.msk.f32.mxu0 %vm1307_vm1, %v1289_v53 }
 0x2ab   :  { %v4294_v60 = vadd.f32 %v2924_v4, %v2429_v22  ;;  %v1298_v1 = vpop.f32.mrb[39].mxu1  ;;  %2942 = vmatmul.mubr.msk.f32.vlgmr.msra.gmra.mrb[52].mxu0 %vm1307_vm1, %v1294_v56  ;;  %v4690_v56 = vsub.s32 3, %v4143_v61 }
 0x2ac   :  { %v4297_v49 = vadd.f32 %v2429_v22, %v1298_v1  ;;  %3216 = vmatpush3.bf16.xpose.msk.msra.mxu0 %vm4224_vm2, %v3211_v38  ;;  %v1000_v38 = vrot.slane %v4319_v21, %v4688_v37 }
 0x2ad   :  { %3219 = vmatprep.subr.msk.bf16.mxu0 %vm4224_vm2, %v3217_v63  ;;  %3415 = vrot.lane.b32.xlu1 %v4686_v45, %s3736_s3  ;;  %v1048_v14 = vrot.slane %v4319_v21, %v4690_v56 }
 0x2b4   :  { %3222 = vmatpush3.bf16.xpose.msk.msra.mxu0 %vm4224_vm2, %v3217_v63 }
 0x2b5   :  { %3225 = vmatprep.subr.msk.bf16.mxu0 %vm4224_vm2, %v3223_v44 }
 0x2bc   :  { %3228 = vmatpush3.bf16.xpose.msk.msra.mxu0 %vm4224_vm2, %v3223_v44 }
 0x2bd   :  { %3231 = vmatprep.subr.msk.bf16.mxu0 %vm4224_vm2, %v3229_v50 }
 0x2c4   :  { %3234 = vmatpush3.bf16.xpose.msk.msra.mxu0 %vm4224_vm2, %v3229_v50  ;;  %v4691_v50 = vsub.s32 4, %v4143_v61 }
 0x2c5   :  { %3276 = vmatprep.subr.bf16.mxu0 %v4208_v47 }
 0x2e1   :  { %v2859_v15 = vpop.f32.mrb[16].mxu0 }
 0x2e2   :  { %v778_v31 = vpop.f32.mrb[17].mxu0  ;;  %v978_v40 = vmul.f32 %v2859_v15, %v976_v33  ;;  %v1072_v15 = vrot.slane %v4319_v21, %v4691_v50 }
 0x2e3   :  { %v977_v41 = vmul.f32 %v976_v33, %v778_v31 }
 0x2e5   :  { %v2862_v34 = vpop.f32.mrb[18].mxu0 }
 0x2e6   :  { %v980_v35 = vmul.f32 %v2862_v34, %v976_v33  ;;  %v788_v36 = vpop.f32.mrb[19].mxu0 }
 0x2e7   :  { %v979_v39 = vmul.f32 %v976_v33, %v788_v36 }
 0x2e9   :  { %v2865_v62 = vpop.f32.mrb[20].mxu0 }
 0x2ea   :  { %v1002_v13 = vmul.f32 %v2865_v62, %v1000_v38  ;;  %v798_v28 = vpop.f32.mrb[21].mxu0 }
 0x2eb   :  { %v1001_v46 = vmul.f32 %v1000_v38, %v798_v28 }
 0x2ec   :  { %v1006_v20 = vadd.f32 %v1002_v13, %v978_v40  ;;  %v4692_v13 = vsub.s32 5, %v4143_v61 }
 0x2ed   :  { %v1005_v24 = vadd.f32 %v1001_v46, %v977_v41  ;;  %v2868_v6 = vpop.f32.mrb[22].mxu0 }
 0x2ee   :  { %v1004_v9 = vmul.f32 %v2868_v6, %v1000_v38  ;;  %v808_v29 = vpop.f32.mrb[23].mxu0  ;;  %v1096_v28 = vrot.slane %v4319_v21, %v4692_v13 }
 0x2ef   :  { %v1003_v17 = vmul.f32 %v1000_v38, %v808_v29 }
 0x2f0   :  { %v1008_v18 = vadd.f32 %v1004_v9, %v980_v35 }
 0x2f1   :  { %v1007_v26 = vadd.f32 %v1003_v17, %v979_v39  ;;  %v2871_v42 = vpop.f32.mrb[24].mxu0 }
 0x2f2   :  { %v1026_v54 = vmul.f32 %v2871_v42, %v1024_v55  ;;  %v818_v0 = vpop.f32.mrb[25].mxu0 }
 0x2f3   :  { %v1025_v10 = vmul.f32 %v1024_v55, %v818_v0 }
 0x2f4   :  { %v1030_v23 = vadd.f32 %v1026_v54, %v1006_v20  ;;  %v4693_v54 = vsub.s32 6, %v4143_v61 }
 0x2f5   :  { %v1029_v22 = vadd.f32 %v1025_v10, %v1005_v24  ;;  %v2874_v25 = vpop.f32.mrb[26].mxu0 }
 0x2f6   :  { %v1028_v12 = vmul.f32 %v2874_v25, %v1024_v55  ;;  %v828_v2 = vpop.f32.mrb[27].mxu0  ;;  %v1120_v0 = vrot.slane %v4319_v21, %v4693_v54  ;;  %v4371_v54 = vld [vmem:[#allocation13] sm:$0xff] }
 0x2f7   :  { %v1027_v53 = vmul.f32 %v1024_v55, %v828_v2 }
 0x2f8   :  { %v1032_v4 = vadd.f32 %v1028_v12, %v1008_v18 }
 0x2f9   :  { %v1031_v63 = vadd.f32 %v1027_v53, %v1007_v26  ;;  %v2877_v1 = vpop.f32.mrb[28].mxu0 }
 0x2fa   :  { %v1050_v7 = vmul.f32 %v2877_v1, %v1048_v14  ;;  %v838_v45 = vpop.f32.mrb[29].mxu0 }
 0x2fb   :  { %v1049_v3 = vmul.f32 %v1048_v14, %v838_v45 }
 0x2fc   :  { %v1054_v19 = vadd.f32 %v1050_v7, %v1030_v23  ;;  %v1144_v7 = vrot.slane %v4319_v21, %v1131_v16 }
 0x2fd   :  { %v1053_v44 = vadd.f32 %v1049_v3, %v1029_v22  ;;  %v2880_v8 = vpop.f32.mrb[30].mxu0 }
 0x2fe   :  { %v1052_v59 = vmul.f32 %v2880_v8, %v1048_v14  ;;  %v848_v58 = vpop.f32.mrb[31].mxu0 }
 0x2ff   :  { %v1051_v31 = vmul.f32 %v1048_v14, %v848_v58 }
 0x300   :  { %v1056_v32 = vadd.f32 %v1052_v59, %v1032_v4 }
 0x301   :  { %v1055_v33 = vadd.f32 %v1051_v31, %v1031_v63  ;;  %v2883_v34 = vpop.f32.mrb[32].mxu0 }
 0x302   :  { %v1074_v35 = vmul.f32 %v2883_v34, %v1072_v15  ;;  %v858_v36 = vpop.f32.mrb[33].mxu0 }
 0x303   :  { %v1073_v37 = vmul.f32 %v1072_v15, %v858_v36 }
 0x304   :  { %v1078_v38 = vadd.f32 %v1074_v35, %v1054_v19  ;;  %v2426_v35 = vld [vmem:[%s4572_s4 + $0x8] ss:$0 sm:$0xff]  ;;  %s3737_s4 = smov 16  }
 0x305   :  { %v1077_v39 = vadd.f32 %v1073_v37, %v1053_v44  ;;  %v2886_v40 = vpop.f32.mrb[34].mxu0 }
 0x306   :  { %v1076_v41 = vmul.f32 %v2886_v40, %v1072_v15  ;;  %v868_v62 = vpop.f32.mrb[35].mxu0 }
 0x307   :  { %v1075_v46 = vmul.f32 %v1072_v15, %v868_v62 }
 0x308   :  { %v1080_v20 = vadd.f32 %v1076_v41, %v1056_v32 }
 0x309   :  { %v1079_v24 = vadd.f32 %v1075_v46, %v1055_v33  ;;  %v2889_v6 = vpop.f32.mrb[36].mxu0 }
 0x30a   :  { %v1098_v9 = vmul.f32 %v2889_v6, %v1096_v28  ;;  %v878_v29 = vpop.f32.mrb[37].mxu0 }
 0x30b   :  { %v1097_v27 = vmul.f32 %v1096_v28, %v878_v29 }
 0x30c   :  { %v1102_v55 = vadd.f32 %v1098_v9, %v1078_v38 }
 0x30d   :  { %v1101_v17 = vadd.f32 %v1097_v27, %v1077_v39  ;;  %v2892_v18 = vpop.f32.mrb[38].mxu0  ;;  %v4360_v27 = vld [vmem:[#allocation8] ss:$0 sm:$0xff] }
 0x30e   :  { %v1100_v26 = vmul.f32 %v2892_v18, %v1096_v28  ;;  %v888_v42 = vpop.f32.mrb[39].mxu0 }
 0x30f   :  { %v1099_v10 = vmul.f32 %v1096_v28, %v888_v42 }
 0x310   :  { %v1104_v23 = vadd.f32 %v1100_v26, %v1080_v20  ;;  %v4369_v26 = vld [vmem:[#allocation13 + $0x8] sm:$0xff] }
 0x311   :  { %v1103_v22 = vadd.f32 %v1099_v10, %v1079_v24  ;;  %v2895_v25 = vpop.f32.mrb[40].mxu0 }
 0x312   :  { %v1122_v12 = vmul.f32 %v2895_v25, %v1120_v0  ;;  %v898_v2 = vpop.f32.mrb[41].mxu0  ;;  %v4694_v25 = vld [vmem:[#allocation49_spill] sm:$0xff] }
 0x313   :  { %v1121_v56 = vmul.f32 %v1120_v0, %v898_v2 }
 0x314   :  { %v1126_v14 = vadd.f32 %v1122_v12, %v1102_v55  ;;  %v4695_v12 = vld [vmem:[#allocation50_spill] sm:$0xff] }
 0x315   :  { %v1125_v53 = vadd.f32 %v1121_v56, %v1101_v17  ;;  %v2898_v4 = vpop.f32.mrb[42].mxu0  ;;  %v4381_v56 = vld [vmem:[#allocation13 + $0x18] sm:$0xff] }
 0x316   :  { %v1124_v63 = vmul.f32 %v2898_v4, %v1120_v0  ;;  %v908_v1 = vpop.f32.mrb[43].mxu0 }
 0x317   :  { %v1123_v45 = vmul.f32 %v1120_v0, %v908_v1 }
 0x318   :  { %v1128_v3 = vadd.f32 %v1124_v63, %v1104_v23  ;;  %v4383_v63 = vld [vmem:[#allocation13 + $0x10] sm:$0xff] }
 0x319   :  { %v1127_v19 = vadd.f32 %v1123_v45, %v1103_v22  ;;  %v2901_v44 = vpop.f32.mrb[44].mxu0 }
 0x31a   :  { %v1146_v8 = vmul.f32 %v2901_v44, %v1144_v7  ;;  %v918_v59 = vpop.f32.mrb[45].mxu0  ;;  %v4696_v44 = vld [vmem:[#allocation48_spill] sm:$0xff] }
 0x31b   :  { %v1518_v58 = vpop.permute.xlu1 %1517  ;;  %v1145_v50 = vmul.f32 %v1144_v7, %v918_v59 }
 0x31c   :  { %v1516_v15 = vpop.permute.xlu0 %1515  ;;  %v1150_v31 = vadd.f32 %v1146_v8, %v1126_v14 }
 0x31d   :  { %2979 = vmatprep.mubr.msk.f32.mxu0 %vm1307_vm1, %v1516_v15  ;;  %v1149_v32 = vadd.f32 %v1145_v50, %v1125_v53  ;;  %v2904_v33 = vpop.f32.mrb[46].mxu0 }
 0x31e   :  { %2980 = vmatmul.mubr.msk.f32.vlgmr.msra.gmra.mrb[54].mxu0 %vm1307_vm1, %v1518_v58  ;;  %v1148_v34 = vmul.f32 %v2904_v33, %v1144_v7  ;;  %v928_v61 = vpop.f32.mrb[47].mxu0 }
 0x31f   :  { %3278 = vmatpush3.bf16.msra.mxu0 %v4208_v47  ;;  %v3416_v16 = vpop.permute.xlu1 %3415  ;;  %v1147_v21 = vmul.f32 %v1144_v7, %v928_v61 }
 0x320   :  { %v3418_v36 = vunpack.i.h.bf16 %v3416_v16  ;;  %v3417_v37 = vunpack.i.l.bf16 %v3416_v16  ;;  %3280 = vmatprep.subr.bf16.mxu0 %v4212_v51  ;;  %v1152_v38 = vadd.f32 %v1148_v34, %v1128_v3 }
 0x321   :  { %v1151_v39 = vadd.f32 %v1147_v21, %v1127_v19  ;;  %v2907_v40 = vpop.f32.mrb[48].mxu0 }
 0x322   :  { %v3235_v41 = vpack.c.bf16 %v3418_v36, %v3417_v37  ;;  %v1170_v62 = vmul.f32 %v2907_v40, %v2426_v35  ;;  %v938_v13 = vpop.f32.mrb[49].mxu0 }
 0x323   :  { %3282 = vmatpush3.bf16.msra.mxu0 %v4212_v51  ;;  %v1169_v28 = vmul.f32 %v2426_v35, %v938_v13 }
 0x324   :  { %3284 = vmatprep.subr.bf16.mxu0 %v4216_v43  ;;  %3236 = vmatprep.subr.bf16.mxu1 %v3235_v41  ;;  %v4354_v47 = vadd.f32 %v1170_v62, %v1150_v31 }
 0x325   :  { %v4356_v46 = vadd.f32 %v1169_v28, %v1149_v32  ;;  %v2910_v20 = vpop.f32.mrb[50].mxu0 }
 0x326   :  { %v1172_v24 = vmul.f32 %v2910_v20, %v2426_v35  ;;  %v948_v6 = vpop.f32.mrb[51].mxu0 }
 0x327   :  { %3286 = vmatpush3.bf16.msra.mxu0 %v4216_v43  ;;  %v1171_v9 = vmul.f32 %v2426_v35, %v948_v6 }
 0x328   :  { %3288 = vmatprep.subr.bf16.mxu0 %v4220_v57  ;;  %v1176_v29 = vadd.f32 %v1172_v24, %v1152_v38 }
 0x329   :  { %v1175_v51 = vadd.f32 %v1171_v9, %v1151_v39 }
 0x32a   :  { %v4363_v55 = vadd.f32 %v4360_v27, %v1176_v29 }
 0x32b   :  { %3290 = vmatpush3.bf16.msra.mxu0 %v4220_v57  ;;  %v4367_v17 = vadd.f32 %v4360_v27, %v1175_v51 }
 0x37e   :  { %v2943_v18 = vpop.f32.mrb[52].mxu0 }
 0x37f   :  { %v1406_v42 = vmul.f32 0.35355338, %v2943_v18  ;;  %v1396_v43 = vpop.f32.mrb[53].mxu0 }
 0x380   :  { %v1405_v0 = vmul.f32 0.35355338, %v1396_v43 }
 0x381   :  { %v1410_v10 = vadd.f32 %v4369_v26, %v1406_v42 }
 0x382   :  { %v1409_v23 = vadd.f32 %v4371_v54, %v1405_v0 }
 0x383   :  { %v1415_v22 = vsel %vm1411_vm3, %v1410_v10, -inf }
 0x384   :  { %1416 = vmax.xlane.f32.xlu1 %v1415_v22  ;;  %v1412_v57 = vsel %vm1411_vm3, %v1409_v23, -inf }
 0x385   :  { %1413 = vmax.xlane.f32.xlu0 %v1412_v57  ;;  %v4697_v57 = vld [vmem:[#allocation52_spill] sm:$0xff] }
 0x395   :  { %3425 = vrot.lane.b32.xlu1 %v4694_v25, %s3736_s3  ;;  %v4698_v25 = vld [vmem:[#allocation54_spill] sm:$0xff] }
 0x399   :  { %3430 = vrot.lane.b32.xlu1 %v4695_v12, %s3736_s3  ;;  %v4699_v12 = vld [vmem:[#allocation51_spill] sm:$0xff] }
 0x3f1   :  { %v2981_v2 = vpop.f32.mrb[54].mxu0 }
 0x3f2   :  { %v1631_v14 = vmul.f32 0.35355338, %v2981_v2  ;;  %v1621_v53 = vpop.f32.mrb[55].mxu0 }
 0x3f3   :  { %v1630_v4 = vmul.f32 0.35355338, %v1621_v53 }
 0x3f4   :  { %v1636_v1 = vadd.f32 %v4381_v56, %v1631_v14 }
 0x3f5   :  { %v1635_v45 = vadd.f32 %v4383_v63, %v1630_v4 }
 0x3f6   :  { %v1640_v7 = vsel %vm1411_vm3, %v1636_v1, -inf }
 0x3f7   :  { %1641 = vmax.xlane.f32.xlu0 %v1640_v7  ;;  %v1637_v3 = vsel %vm1411_vm3, %v1635_v45, -inf }
 0x3fb   :  { %1638 = vmax.xlane.f32.xlu0 %v1637_v3 }
 0x411   :  { %v1417_v19 = vpop.xlane.xlu1 %1416  ;;  %3420 = vrot.lane.b32.xlu0 %v4696_v44, %s3736_s3 }
 0x412   :  { %v1419_v8 = vsub.f32 %v1410_v10, %v1417_v19  ;;  %v1414_v59 = vpop.xlane.xlu0 %1413 }
 0x413   :  { %v1418_v58 = vsub.f32 %v1409_v23, %v1414_v59 }
 0x414   :  { %v1422_v50 = vmul.f32 1.442695, %v1419_v8 }
 0x415   :  { %v1420_v15 = vmul.f32 1.442695, %v1418_v58  ;;  %v3426_v34 = vpop.permute.xlu1 %3425 }
 0x416   :  { %v3428_v36 = vunpack.i.h.bf16 %v3426_v34  ;;  %v3427_v38 = vunpack.i.l.bf16 %v3426_v34 }
 0x417   :  { %3474 = vpow2.f32 %v1420_v15 }
 0x418   :  { %3476 = vpow2.f32 %v1422_v50  ;;  %v3243_v20 = vpack.c.bf16 %v3428_v36, %v3427_v38 }
 0x419   :  { %v3431_v62 = vpop.permute.xlu1 %3430 }
 0x41a   :  { %v3433_v24 = vunpack.i.h.bf16 %v3431_v62  ;;  %v3432_v6 = vunpack.i.l.bf16 %v3431_v62 }
 0x421   :  { %v4391_v31 = vpop.eup %3474 }
 0x422   :  { %v4393_v32 = vpop.eup %3476  ;;  %2960 = vmatprep.mubr.msk.f32.mxu1 %vm1411_vm3, %v4391_v31 }
 0x423   :  { %2961 = vmatmul.mubr.msk.f32.vlgmr.msra.gmra.mrb[40].mxu1 %vm1411_vm3, %v4393_v32 }
 0x424   :  { %3238 = vmatpush3.bf16.msra.mxu1 %v3235_v41  ;;  %v3247_v41 = vpack.c.bf16 %v3433_v24, %v3432_v6 }
 0x484   :  { %v1642_v33 = vpop.xlane.xlu0 %1641 }
 0x485   :  { %v1644_v21 = vsub.f32 %v1636_v1, %v1642_v33 }
 0x487   :  { %v1647_v13 = vmul.f32 1.442695, %v1644_v21 }
 0x488   :  { %v1639_v61 = vpop.xlane.xlu0 %1638 }
 0x489   :  { %v1643_v16 = vsub.f32 %v1635_v45, %v1639_v61 }
 0x48b   :  { %v1645_v35 = vmul.f32 1.442695, %v1643_v16 }
 0x48c   :  { %v3421_v37 = vpop.permute.xlu0 %3420 }
 0x48d   :  { %3478 = vpow2.f32 %v1645_v35  ;;  %v3423_v39 = vunpack.i.h.bf16 %v3421_v37  ;;  %v3422_v40 = vunpack.i.l.bf16 %v3421_v37 }
 0x48e   :  { %3480 = vpow2.f32 %v1647_v13 }
 0x48f   :  { %v3239_v28 = vpack.c.bf16 %v3423_v39, %v3422_v40 }
 0x491   :  { %3240 = vmatprep.subr.bf16.mxu1 %v3239_v28 }
 0x492   :  { %3242 = vmatpush3.bf16.msra.mxu1 %v3239_v28 }
 0x493   :  { %3244 = vmatprep.subr.bf16.mxu1 %v3243_v20 }
 0x496   :  { %3246 = vmatpush3.bf16.msra.mxu1 %v3243_v20 }
 0x497   :  { %v4399_v9 = vpop.eup %3478  ;;  %3248 = vmatprep.subr.bf16.mxu1 %v3247_v41 }
 0x498   :  { %2998 = vmatprep.mubr.msk.f32.mxu1 %vm1411_vm3, %v4399_v9  ;;  %v4406_v29 = vpop.eup %3480 }
 0x49a   :  { %3250 = vmatpush3.bf16.msra.mxu1 %v3247_v41 }
 0x49b   :  { %3253 = vmatprep.subr.msk.bf16.mxu1 %vm4224_vm2, %v4180_v52 }
 0x49d   :  { %2999 = vmatmul.mubr.msk.f32.vlgmr.msra.gmra.mrb[42].mxu1 %vm1411_vm3, %v4406_v29 }
 0x49e   :  { %3017 = vmatprep.mubr.msk.f32.mxu1 %vm1307_vm1, %v4297_v49 }
 0x4a3   :  { %3256 = vmatpush3.bf16.xpose.msk.msra.mxu1 %vm4224_vm2, %v4180_v52 }
 0x4a4   :  { %3259 = vmatprep.subr.msk.bf16.mxu1 %vm4224_vm2, %v4184_v30 }
 0x4ab   :  { %3262 = vmatpush3.bf16.xpose.msk.msra.mxu1 %vm4224_vm2, %v4184_v30 }
 0x4ac   :  { %3265 = vmatprep.subr.msk.bf16.mxu1 %vm4224_vm2, %v4188_v11 }
 0x4b3   :  { %3268 = vmatpush3.bf16.xpose.msk.msra.mxu1 %vm4224_vm2, %v4188_v11 }
 0x4b4   :  { %3271 = vmatprep.subr.msk.bf16.mxu1 %vm4224_vm2, %v4195_v5 }
 0x4bb   :  { %3274 = vmatpush3.bf16.xpose.msk.msra.mxu1 %vm4224_vm2, %v4195_v5 }
 0x4c2   :  { %3018 = vmatmul.mubr.msk.f32.vlgmr.msra.gmra.mrb[44].mxu1 %vm1307_vm1, %v4294_v60 }
 0x4f6   :  { %v4435_v52 = vpop.f32.mrb[40].mxu1 }
 0x4f7   :  { %v4437_v30 = vpop.f32.mrb[41].mxu1 }
 0x570   :  { %v4439_v51 = vpop.f32.mrb[42].mxu1 }
 0x571   :  { %v4441_v18 = vpop.f32.mrb[43].mxu1 }
 0x595   :  { %v3019_v11 = vpop.f32.mrb[44].mxu1 }
 0x596   :  { %v1873_v42 = vmul.f32 0.35355338, %v3019_v11  ;;  %v1863_v43 = vpop.f32.mrb[45].mxu1 }
 0x597   :  { %v1872_v0 = vmul.f32 0.35355338, %v1863_v43 }
 0x598   :  { %v1875_v10 = vadd.f32 %v1873_v42, %v4369_v26  ;;  %v4700_v26 = vld [vmem:[#allocation53_spill] sm:$0xff] }
 0x599   :  { %v1874_v23 = vadd.f32 %v1872_v0, %v4371_v54 }
 0x59a   :  { %v1879_v5 = vsel %vm1411_vm3, %v1875_v10, -inf }
 0x59b   :  { %1880 = vmax.xlane.f32.xlu1 %v1879_v5  ;;  %v1876_v22 = vsel %vm1411_vm3, %v1874_v23, -inf }
 0x59c   :  { %1877 = vmax.xlane.f32.xlu0 %v1876_v22  ;;  %v1652_v22 = vsel %vm1411_vm3, %v4406_v29, 0.0 }
 0x5ac   :  { %3440 = vrot.lane.b32.xlu1 %v4697_v57, %s3735_s6 }
 0x5b0   :  { %3450 = vrot.lane.b32.xlu1 %v4698_v25, %s3735_s6 }
 0x5b2   :  { %3435 = vrot.lane.b32.xlu0 %v4699_v12, %s3735_s6 }
 0x5b4   :  { %1981 = vrot.lane.b32.xlu1 %v4294_v60, %s3735_s6 }
 0x5b6   :  { %3445 = vrot.lane.b32.xlu0 %v4700_v26, %s3735_s6 }
 0x5b8   :  { %3460 = vrot.lane.b32.xlu1 %v4697_v57, %s3736_s3 }
 0x5ba   :  { %1979 = vrot.lane.b32.xlu0 %v4297_v49, %s3735_s6 }
 0x5be   :  { %3455 = vrot.lane.b32.xlu0 %v4699_v12, %s3736_s3 }
 0x628   :  { %v1881_v54 = vpop.xlane.xlu1 %1880 }
 0x629   :  { %v1883_v2 = vsub.f32 %v1875_v10, %v1881_v54  ;;  %v1878_v14 = vpop.xlane.xlu0 %1877 }
 0x62a   :  { %v1882_v53 = vsub.f32 %v1874_v23, %v1878_v14 }
 0x62b   :  { %v1886_v4 = vmul.f32 1.442695, %v1883_v2 }
 0x62c   :  { %v1884_v1 = vmul.f32 1.442695, %v1882_v53  ;;  %v3441_v7 = vpop.permute.xlu1 %3440 }
 0x62d   :  { %v3436_v60 = vpop.permute.xlu0 %3435  ;;  %v3443_v59 = vunpack.i.h.bf16 %v3441_v7  ;;  %v3442_v58 = vunpack.i.l.bf16 %v3441_v7 }
 0x62e   :  { %3482 = vpow2.f32 %v1884_v1  ;;  %v3438_v45 = vunpack.i.h.bf16 %v3436_v60  ;;  %v3437_v3 = vunpack.i.l.bf16 %v3436_v60 }
 0x62f   :  { %3484 = vpow2.f32 %v1886_v4  ;;  %v3297_v61 = vpack.c.bf16 %v3443_v59, %v3442_v58 }
 0x630   :  { %v3291_v19 = vpack.c.bf16 %v3438_v45, %v3437_v3  ;;  %v3451_v44 = vpop.permute.xlu1 %3450 }
 0x631   :  { %v3446_v8 = vpop.permute.xlu0 %3445  ;;  %v3453_v28 = vunpack.i.h.bf16 %v3451_v44  ;;  %v3452_v20 = vunpack.i.l.bf16 %v3451_v44 }
 0x632   :  { %3293 = vmatprep.subr.msk.bf16.mxu0 %vm4224_vm2, %v3291_v19  ;;  %v3448_v39 = vunpack.i.h.bf16 %v3446_v8  ;;  %v3447_v40 = vunpack.i.l.bf16 %v3446_v8  ;;  %v1427_v8 = vsel %vm1411_vm3, %v4393_v32, 0.0  ;;  %v2275_v32 = vld [vmem:[%s4579_s11] sm:$0xff] }
 0x633   :  { %v3309_v24 = vpack.c.bf16 %v3453_v28, %v3452_v20  ;;  %v1196_v20 = vadd.f32 %v4360_v27, %v4354_v47 }
 0x634   :  { %v1982_v49 = vpop.permute.xlu1 %1981  ;;  %v3303_v13 = vpack.c.bf16 %v3448_v39, %v3447_v40 }
 0x635   :  { %v1980_v50 = vpop.permute.xlu0 %1979 }
 0x638   :  { %v3483_v15 = vpop.eup %3482  ;;  %v3461_v33 = vpop.permute.xlu1 %3460 }
 0x639   :  { %v4465_v34 = vpop.eup %3484  ;;  %3036 = vmatprep.mubr.msk.f32.mxu0 %vm1411_vm3, %v3483_v15  ;;  %v3456_v16 = vpop.permute.xlu0 %3455  ;;  %v3463_v21 = vunpack.i.h.bf16 %v3461_v33  ;;  %v3462_v35 = vunpack.i.l.bf16 %v3461_v33  ;;  %v1888_v57 = vsel %vm1411_vm3, %v3483_v15, 0.0 }
 0x63a   :  { %v3458_v36 = vunpack.i.h.bf16 %v3456_v16  ;;  %v3457_v37 = vunpack.i.l.bf16 %v3456_v16  ;;  %3037 = vmatmul.mubr.msk.f32.vlgmr.msra.gmra.mrb[56].mxu0 %vm1411_vm3, %v4465_v34 }
 0x63b   :  { %3296 = vmatpush3.bf16.xpose.msk.msra.mxu0 %vm4224_vm2, %v3291_v19  ;;  %3055 = vmatprep.mubr.msk.f32.mxu0 %vm1307_vm1, %v1980_v50  ;;  %v3319_v62 = vpack.c.bf16 %v3463_v21, %v3462_v35 }
 0x63c   :  { %v3315_v38 = vpack.c.bf16 %v3458_v36, %v3457_v37  ;;  %3299 = vmatprep.subr.msk.bf16.mxu0 %vm4224_vm2, %v3297_v61 }
 0x63e   :  { %3316 = vmatprep.subr.bf16.mxu1 %v3315_v38 }
 0x63f   :  { %3318 = vmatpush3.bf16.msra.mxu1 %v3315_v38 }
 0x640   :  { %3320 = vmatprep.subr.bf16.mxu1 %v3319_v62 }
 0x643   :  { %3302 = vmatpush3.bf16.xpose.msk.msra.mxu0 %vm4224_vm2, %v3297_v61  ;;  %3322 = vmatpush3.bf16.msra.mxu1 %v3319_v62 }
 0x644   :  { %3305 = vmatprep.subr.msk.bf16.mxu0 %vm4224_vm2, %v3303_v13 }
 0x64b   :  { %3308 = vmatpush3.bf16.xpose.msk.msra.mxu0 %vm4224_vm2, %v3303_v13 }
 0x64c   :  { %3311 = vmatprep.subr.msk.bf16.mxu0 %vm4224_vm2, %v3309_v24 }
 0x653   :  { %3314 = vmatpush3.bf16.xpose.msk.msra.mxu0 %vm4224_vm2, %v3309_v24 }
 0x65a   :  { %3056 = vmatmul.mubr.msk.f32.vlgmr.msra.gmra.mrb[58].mxu0 %vm1307_vm1, %v1982_v49  ;;  %v1891_v49 = vsel %vm1411_vm3, %v4465_v34, 0.0  ;;  %v2276_v34 = vld [vmem:[%s4579_s11 + $0x8] sm:$0xff] }
 0x65b   :  { %v3331_v16 = vpack.c.bf16 %v2276_v34, %v2275_v32 }
 0x70d   :  { %v4486_v6 = vpop.f32.mrb[56].mxu0 }
 0x70e   :  { %v4488_v41 = vpop.f32.mrb[57].mxu0 }
 0x72d   :  { %v3057_v11 = vpop.f32.mrb[58].mxu0 }
 0x72e   :  { %v2095_v42 = vmul.f32 0.35355338, %v3057_v11  ;;  %v2085_v43 = vpop.f32.mrb[59].mxu0 }
 0x72f   :  { %v2094_v0 = vmul.f32 0.35355338, %v2085_v43  ;;  %v1195_v43 = vadd.f32 %v4360_v27, %v4356_v46 }
 0x730   :  { %v2097_v10 = vadd.f32 %v2095_v42, %v4381_v56  ;;  %v1649_v56 = vsel %vm1411_vm3, %v4399_v9, 0.0 }
 0x731   :  { %v2096_v23 = vadd.f32 %v2094_v0, %v4383_v63  ;;  %v1424_v63 = vsel %vm1411_vm3, %v4391_v31, 0.0 }
 0x732   :  { %v2101_v5 = vsel %vm1411_vm3, %v2097_v10, -inf }
 0x733   :  { %2102 = vmax.xlane.f32.xlu1 %v2101_v5  ;;  %v2098_v48 = vsel %vm1411_vm3, %v2096_v23, -inf }
 0x734   :  { %2099 = vmax.xlane.f32.xlu0 %v2098_v48 }
 0x744   :  { %3470 = vrot.lane.b32.xlu1 %v4698_v25, %s3736_s3 }
 0x74a   :  { %3465 = vrot.lane.b32.xlu0 %v4700_v26, %s3736_s3 }
 0x768   :  { %1653 = vadd.xlane.f32.xlu1 %v1652_v22 }
 0x769   :  { %1650 = vadd.xlane.f32.xlu0 %v1649_v56 }
 0x76c   :  { %1425 = vadd.xlane.f32.xlu1 %v1424_v63 }
 0x770   :  { %1889 = vadd.xlane.f32.xlu1 %v1888_v57 }
 0x7c0   :  { %v2103_v12 = vpop.xlane.xlu1 %2102 }
 0x7c1   :  { %v2105_v25 = vsub.f32 %v2097_v10, %v2103_v12  ;;  %v2100_v54 = vpop.xlane.xlu0 %2099 }
 0x7c2   :  { %v2104_v2 = vsub.f32 %v2096_v23, %v2100_v54 }
 0x7c3   :  { %v2108_v26 = vmul.f32 1.442695, %v2105_v25 }
 0x7c4   :  { %v2106_v14 = vmul.f32 1.442695, %v2104_v2  ;;  %v3471_v53 = vpop.permute.xlu1 %3470 }
 0x7c5   :  { %v3473_v29 = vunpack.i.h.bf16 %v3471_v53  ;;  %v3466_v4 = vpop.permute.xlu0 %3465  ;;  %v3472_v1 = vunpack.i.l.bf16 %v3471_v53 }
 0x7c6   :  { %3486 = vpow2.f32 %v2106_v14  ;;  %v3468_v9 = vunpack.i.h.bf16 %v3466_v4  ;;  %v3467_v7 = vunpack.i.l.bf16 %v3466_v4 }
 0x7c7   :  { %3488 = vpow2.f32 %v2108_v26  ;;  %v3327_v31 = vpack.c.bf16 %v3473_v29, %v3472_v1 }
 0x7c8   :  { %v3323_v60 = vpack.c.bf16 %v3468_v9, %v3467_v7 }
 0x7ca   :  { %3324 = vmatprep.subr.bf16.mxu1 %v3323_v60 }
 0x7cb   :  { %3326 = vmatpush3.bf16.msra.mxu1 %v3323_v60 }
 0x7cc   :  { %3328 = vmatprep.subr.bf16.mxu1 %v3327_v31 }
 0x7cf   :  { %3330 = vmatpush3.bf16.msra.mxu1 %v3327_v31 }
 0x7d0   :  { %v3487_v45 = vpop.eup %3486  ;;  %3332 = vmatprep.subr.bf16.mxu1 %v3331_v16 }
 0x7d1   :  { %v3489_v3 = vpop.eup %3488  ;;  %3074 = vmatprep.mubr.msk.f32.mxu1 %vm1411_vm3, %v3487_v45  ;;  %v2110_v19 = vsel %vm1411_vm3, %v3487_v45, 0.0 }
 0x7d2   :  { %2111 = vadd.xlane.f32.xlu0 %v2110_v19  ;;  %3075 = vmatmul.mubr.msk.f32.vlgmr.msra.gmra.mrb[46].mxu1 %vm1411_vm3, %v3489_v3  ;;  %v2113_v44 = vsel %vm1411_vm3, %v3489_v3, 0.0 }
 0x7d3   :  { %3334 = vmatpush3.bf16.msra.mxu1 %v3331_v16 }
 0x7d6   :  { %2114 = vadd.xlane.f32.xlu0 %v2113_v44 }
 0x7da   :  { %1428 = vadd.xlane.f32.xlu0 %v1427_v8 }
 0x7de   :  { %1892 = vadd.xlane.f32.xlu0 %v1891_v49 }
 0x7f5   :  { %v1654_v59 = vpop.xlane.xlu1 %1653 }
 0x7f6   :  { %3490 = vrcp.f32 %v1654_v59  ;;  %v1651_v58 = vpop.xlane.xlu0 %1650 }
 0x7f7   :  { %3492 = vrcp.f32 %v1651_v58 }
 0x7f9   :  { %v1426_v37 = vpop.xlane.xlu1 %1425 }
 0x7fa   :  { %3494 = vrcp.f32 %v1426_v37 }
 0x7fd   :  { %v1890_v13 = vpop.xlane.xlu1 %1889 }
 0x800   :  { %v3491_v50 = vpop.eup %3490 }
 0x801   :  { %v3493_v15 = vpop.eup %3492  ;;  %v1763_v33 = vmul.f32 %v3491_v50, %v4439_v51  ;;  %v2277_v51 = vld [vmem:[%s4579_s11 + $0x10] sm:$0xff] }
 0x802   :  { %v1762_v61 = vmul.f32 %v3493_v15, %v4441_v18  ;;  %v2278_v18 = vld [vmem:[%s4579_s11 + $0x18] sm:$0xff]  ;;  %s3738_s11 = smov [#allocation16]  }
 0x803   :  { %1768 = vrot.lane.b32.xlu0 %v1763_v33, %s3737_s4  ;;  %v3335_v21 = vpack.c.bf16 %v2278_v18, %v2277_v51  ;;  %s2392_s27 = sshll.u32 %s3738_s11, 4  ;;  %s2393_s27 = int_to_ptr.vmem [resolvable:$true] %s2392_s27 }
 0x804   :  { %1766 = vrot.lane.b32.xlu1 %v1762_v61, %s3737_s4  ;;  %v3495_v40 = vpop.eup %3494  ;;  %s3690_s8 = scalar_lea.vmem %s2393_s27, 512  ;;  %p3695_p9 = scmp.lt.s32.totalorder %s2393_s27, %s2393_s27 }
 0x805   :  { %3336 = vmatprep.subr.bf16.mxu1 %v3335_v21  ;;  %v1513_v11 = vmul.f32 %v3495_v40, %v4437_v30  ;;  %p3691_p8 = scmp.ne.s32.totalorder %s2393_s27, %s3690_s8  ;;  %p3696_p10 = scmp.lt.s32.totalorder %s3690_s8, %s3690_s8 }
 0x806   :  { %3338 = vmatpush3.bf16.msra.mxu1 %v3335_v21 }
 0x807   :  { %p3697_p11 = por %p3696_p10, %p3695_p9 }
 0x809   :  { %p3698_p12 = pnand %p3697_p11, %p3691_p8 }
 0x85f   :  { %v2112_v35 = vpop.xlane.xlu0 %2111 }
 0x863   :  { %v2115_v36 = vpop.xlane.xlu0 %2114 }
 0x867   :  { %v1429_v38 = vpop.xlane.xlu0 %1428 }
 0x868   :  { %3496 = vrcp.f32 %v1429_v38 }
 0x86b   :  { %v1893_v39 = vpop.xlane.xlu0 %1892 }
 0x86c   :  { %3498 = vrcp.f32 %v1893_v39 }
 0x872   :  { %v3497_v62 = vpop.eup %3496 }
 0x873   :  { %v1514_v28 = vmul.f32 %v3497_v62, %v4435_v52  ;;  %v2482_v62 = vld [vmem:[#allocation14] ss:$0 sm:$0xff] }
 0x875   :  { %v1769_v24 = vpop.permute.xlu0 %1768 }
 0x876   :  { %v3499_v42 = vpop.eup %3498  ;;  %v1774_v0 = vsel %vm1772_vm4, %v1514_v28, %v1769_v24  ;;  %v1767_v10 = vpop.permute.xlu1 %1766 }
 0x877   :  { %v2236_v23 = vadd.f32 %v1774_v0, %v1196_v20  ;;  %v1773_v5 = vsel %vm1772_vm4, %v1513_v11, %v1767_v10  ;;  %v1978_v48 = vmul.f32 %v3499_v42, %v4486_v6 }
 0x878   :  { %v2235_v52 = vadd.f32 %v1773_v5, %v1195_v43 }
 0x879   :  { %v2240_v22 = vmul.f32 %v2236_v23, %v2236_v23 }
 0x87a   :  { %v2239_v56 = vmul.f32 %v2235_v52, %v2235_v52 }
 0x87b   :  { %v2244_v63 = vmul.f32 %v2240_v22, %v2236_v23 }
 0x87c   :  { %v2243_v47 = vmul.f32 %v2239_v56, %v2235_v52 }
 0x87d   :  { %v2248_v57 = vmul.f32 0.044715, %v2244_v63 }
 0x87e   :  { %v2247_v12 = vmul.f32 0.044715, %v2243_v47 }
 0x87f   :  { %v2252_v30 = vadd.f32 %v2248_v57, %v2236_v23 }
 0x880   :  { %v2251_v25 = vadd.f32 %v2247_v12, %v2235_v52 }
 0x881   :  { %v2256_v54 = vmul.f32 0.7978846, %v2252_v30 }
 0x882   :  { %v2255_v2 = vmul.f32 0.7978846, %v2251_v25 }
 0x883   :  { %3500 = vtanh.f32 %v2256_v54 }
 0x884   :  { %3502 = vtanh.f32 %v2255_v2 }
 0x885   :  { %3504 = vrcp.f32 %v2112_v35 }
 0x886   :  { %3506 = vrcp.f32 %v2115_v36 }
 0x887   :  { %3508 = vrcp.f32 %v1890_v13 }
 0x88d   :  { %v3501_v46 = vpop.eup %3500 }
 0x88e   :  { %v3503_v27 = vpop.eup %3502  ;;  %v2264_v26 = vadd.f32 1.0, %v3501_v46 }
 0x88f   :  { %v2263_v14 = vadd.f32 1.0, %v3503_v27  ;;  %v3505_v9 = vpop.eup %3504 }
 0x890   :  { %v2268_v53 = vmul.f32 0.5, %v2264_v26  ;;  %v3507_v31 = vpop.eup %3506 }
 0x891   :  { %v2267_v29 = vmul.f32 0.5, %v2263_v14  ;;  %v3509_v3 = vpop.eup %3508 }
 0x892   :  { %v2272_v4 = vmul.f32 %v2268_v53, %v2236_v23  ;;  %v1977_v19 = vmul.f32 %v3509_v3, %v4488_v41 }
 0x893   :  { %v2271_v6 = vmul.f32 %v2267_v29, %v2235_v52 }
 0x895   :  { %3085 = vmatprep.mubr.msk.f32.mxu1 %vm173_vm0, %v2271_v6 }
 0x896   :  { %3086 = vmatmul.mubr.msk.f32.vlgmr.msra.gmra.mrb[48].mxu1 %vm173_vm0, %v2272_v4 }
 0x8a5   :  { %v3076_v1 = vpop.f32.mrb[46].mxu1 }
 0x8a6   :  { %v2212_v7 = vpop.f32.mrb[47].mxu1  ;;  %v2224_v45 = vmul.f32 %v3507_v31, %v3076_v1 }
 0x8a7   :  { %v2223_v60 = vmul.f32 %v3505_v9, %v2212_v7 }
 0x8a9   :  { %2227 = vrot.lane.b32.xlu1 %v2223_v60, %s3737_s4 }
 0x8ad   :  { %2229 = vrot.lane.b32.xlu1 %v2224_v45, %s3737_s4 }
 0x91b   :  { %v2228_v44 = vpop.permute.xlu1 %2227 }
 0x91c   :  { %v2233_v8 = vsel %vm1772_vm4, %v1977_v19, %v2228_v44 }
 0x91d   :  { %v2237_v49 = vadd.f32 %v2233_v8, %v4367_v17 }
 0x91f   :  { %v2241_v59 = vmul.f32 %v2237_v49, %v2237_v49  ;;  %v2230_v58 = vpop.permute.xlu1 %2229 }
 0x920   :  { %v2234_v50 = vsel %vm1772_vm4, %v1978_v48, %v2230_v58 }
 0x921   :  { %v2245_v15 = vmul.f32 %v2241_v59, %v2237_v49  ;;  %v2238_v33 = vadd.f32 %v2234_v50, %v4363_v55 }
 0x923   :  { %v2249_v61 = vmul.f32 0.044715, %v2245_v15  ;;  %v2242_v32 = vmul.f32 %v2238_v33, %v2238_v33 }
 0x925   :  { %v2253_v34 = vadd.f32 %v2249_v61, %v2237_v49  ;;  %v2246_v16 = vmul.f32 %v2242_v32, %v2238_v33 }
 0x927   :  { %v2257_v51 = vmul.f32 0.7978846, %v2253_v34  ;;  %v2250_v18 = vmul.f32 0.044715, %v2246_v16 }
 0x929   :  { %3510 = vtanh.f32 %v2257_v51  ;;  %v2254_v41 = vadd.f32 %v2250_v18, %v2238_v33 }
 0x92b   :  { %v2258_v21 = vmul.f32 0.7978846, %v2254_v41 }
 0x92d   :  { %3512 = vtanh.f32 %v2258_v21 }
 0x933   :  { %v3511_v35 = vpop.eup %3510 }
 0x934   :  { %v2265_v36 = vadd.f32 1.0, %v3511_v35 }
 0x936   :  { %v2269_v17 = vmul.f32 0.5, %v2265_v36 }
 0x937   :  { %v3513_v37 = vpop.eup %3512 }
 0x938   :  { %v2273_v38 = vmul.f32 %v2269_v17, %v2237_v49  ;;  %v2266_v39 = vadd.f32 1.0, %v3513_v37 }
 0x93a   :  { %3088 = vmatprep.mubr.msk.f32.mxu1 %vm173_vm0, %v2273_v38  ;;  %v2270_v40 = vmul.f32 0.5, %v2266_v39 }
 0x93c   :  { %v2274_v55 = vmul.f32 %v2270_v40, %v2238_v33 }
 0x93e   :  { %3089 = vmatmul.mubr.msk.f32.gmra.mrb[50].mxu1 %vm173_vm0, %v2274_v55 }
 0x969   :  { %v3087_v13 = vpop.f32.mrb[48].mxu1 }
 0x96a   :  { %v2370_v28 = vadd.f32 %v3087_v13, %v2482_v62  ;;  %v2364_v20 = vpop.f32.mrb[49].mxu1 }
 0x96b   :  { %v2365_v24 = vadd.f32 %v2482_v62, %v2364_v20 }
 0x96c   :  { %2384 = vst.msk [vmem:[#allocation16 + $0x8] sm:$0xff] %vm173_vm0, %v2370_v28 }
 0x96d   :  { %2383 = vst.msk [vmem:[#allocation16] sm:$0xff] %vm173_vm0, %v2365_v24 }
 0xa11   :  { %v3090_v11 = vpop.f32.mrb[50].mxu1 }
 0xa12   :  { %v2380_v42 = vadd.f32 %v3090_v11, %v2482_v62  ;;  %v2374_v43 = vpop.f32.mrb[51].mxu1 }
 0xa13   :  { %v2375_v0 = vadd.f32 %v2482_v62, %v2374_v43 }
 0xa14   :  { %2386 = vst.msk [vmem:[#allocation16 + $0x18] sm:$0xff] %vm173_vm0, %v2380_v42 }
 0xa15   :  { %2385 = vst.msk [vmem:[#allocation16 + $0x10] sm:$0xff] %vm173_vm0, %v2375_v0 }
 0xa16   :  { %3701 = shalt.err (!%p3698_p12)
}
 0xa17   :  { %s3702_s5 = scalar_lea.hbm %s4581_s13, 512 }
 0xa18   :  { %p3703_p13 = scmp.ne.s32.totalorder %s4581_s13, %s3702_s5  ;;  %p3706_p0 = scmp.lt.u32.totalorder %s3702_s5, %s4581_s13 }
 0xa1a   :  { %p3708_p1 = pnand %p3706_p0, %p3703_p13 }
 0xa1c   :  { %3711 = shalt.err (!%p3708_p1)
}
 0xa1d   :  { %2398 = dma.vmem_to_hbm [thread:$0]  %s2393_s27, 512, %s4581_s13, [#allocation4], %s3726_s20, %s3726_s20, %s3727_s21  }
 0xa1e   :  { %3722 = dma.done.wait [#allocation4], 512  }
 0xa1f   :  { %3723 = vsyncadd [#allocation4], 4294966784 }
 0xa20   :  { %2402 = vsyncpa [#allocation3], 1 }
 0xa21   :  { %2403 = vsyncpa [#allocation6], 1 }
 0xa22   :  { %2404 = vsyncpa [#allocation9], 1 }
 0xa23   :  { %2405 = vsyncpa [#allocation12], 1 }
 0xa24   :  { %2406 = vsyncpa [#allocation15], 1 }
 0xa25   :  { %2407 = vsyncpa [#allocation4], 1 }

</bundles_post_ra>
